<compile_context>
chip_gen: v5e
topology: v5e:2x2
jax: 0.10.0
libtpu: 0.0.40
codegen_flags: <defaults>
</compile_context>

<pallas_src>
import functools
import math

import jax
import jax.numpy as jnp
from jax import lax
from jax.experimental import pallas as pl
from jax.experimental.pallas import tpu as pltpu


def _round_up(x, m):
    return ((x + m - 1) // m) * m


def _gru_recurrence_kernel(
    gxr_ref, gxz_ref, gxn_ref,   # (TT, B, H) f32 : precomputed input projections
    whr_ref, whz_ref, whn_ref,   # (H, H)  mxu dtype : recurrent weights (resident)
    bhn_ref,                     # (1, H)  f32 : hidden bias of the n gate
    out_ref,                     # (B, H)  f32 : final hidden of this direction
    h_ref,                       # scratch (B, H) f32 : carried hidden state
    *, seq_len, steps_per_block,
):
    """Grid = (direction, time_chunk). Each call advances TT GRU time steps."""
    c = pl.program_id(1)

    @pl.when(c == 0)
    def _():
        h_ref[...] = jnp.zeros_like(h_ref)   # PyTorch default h_0 = 0

    w_r = whr_ref[...]
    w_z = whz_ref[...]
    w_n = whn_ref[...]
    b_n = bhn_ref[...]

    needs_mask = (seq_len % steps_per_block) != 0

    def step(i, h):
        hm = h.astype(w_r.dtype)
        gh_r = jnp.dot(hm, w_r, preferred_element_type=jnp.float32)
        gh_z = jnp.dot(hm, w_z, preferred_element_type=jnp.float32)
        gh_n = jnp.dot(hm, w_n, preferred_element_type=jnp.float32) + b_n
        r = jax.nn.sigmoid(gxr_ref[i] + gh_r)       # b_ir+b_hr already folded in
        z = jax.nn.sigmoid(gxz_ref[i] + gh_z)       # b_iz+b_hz already folded in
        n = jnp.tanh(gxn_ref[i] + r * gh_n)
        h_new = (1.0 - z) * n + z * h
        if needs_mask:  # skip padded tail steps (keep previous hidden state)
            h_new = jnp.where(c * steps_per_block + i < seq_len, h_new, h)
        return h_new

    h = lax.fori_loop(0, steps_per_block, step, h_ref[...], unroll=True)
    h_ref[...] = h

    @pl.when(c == pl.num_programs(1) - 1)
    def _():
        out_ref[...] = h


def _gru_final_hidden(x, params, *, steps_per_block=16, mxu_dtype=jnp.bfloat16):
    """Final hidden state per direction: returns (D, B, H) float32."""
    x = x.astype(jnp.float32)
    B, T, F = x.shape
    D = len(params)
    H = params[0]["w_hh"].shape[1]

    TT = max(1, min(steps_per_block, T))        # time steps per grid iteration
    NT = pl.cdiv(T, TT)
    T_pad = NT * TT
    B_pad = max(8, _round_up(B, 8))             # fill f32 sublanes

    if B_pad != B:
        x = jnp.pad(x, ((0, B_pad - B), (0, 0), (0, 0)))
    x_mxu = x.astype(mxu_dtype)

    gx_r, gx_z, gx_n = [], [], []
    whh_r, whh_z, whh_n, b_hn = [], [], [], []
    for d, p in enumerate(params):
        w_ih = p["w_ih"].astype(jnp.float32)    # (3H, F)  gate order [r | z | n]
        w_hh = p["w_hh"].astype(jnp.float32)    # (3H, H)
        b_ih = p["b_ih"].astype(jnp.float32)    # (3H,)
        b_hh = p["b_hh"].astype(jnp.float32)    # (3H,)

        # Direction 1 (bidirectional) consumes the time-reversed sequence.
        x_d = x_mxu if d == 0 else x_mxu[:, ::-1, :]

        # Hoisted input projection: one big MXU matmul for all T steps.
        bias_fold = b_ih + jnp.concatenate(
            [b_hh[: 2 * H], jnp.zeros((H,), jnp.float32)])
        gx = jnp.dot(x_d.reshape(B_pad * T, F), w_ih.T.astype(mxu_dtype),
                     preferred_element_type=jnp.float32) + bias_fold
        gx = gx.reshape(B_pad, T, 3, H).transpose(2, 1, 0, 3)    # (3, T, B, H)
        if T_pad != T:
            gx = jnp.pad(gx, ((0, 0), (0, T_pad - T), (0, 0), (0, 0)))
        gx_r.append(gx[0]), gx_z.append(gx[1]), gx_n.append(gx[2])

        # Per-gate recurrent weights -> lane-aligned gate math inside the kernel.
        whh_t = w_hh.T                                           # (H, 3H)
        whh_r.append(whh_t[:, 0 * H:1 * H].astype(mxu_dtype))
        whh_z.append(whh_t[:, 1 * H:2 * H].astype(mxu_dtype))
        whh_n.append(whh_t[:, 2 * H:3 * H].astype(mxu_dtype))
        b_hn.append(b_hh[2 * H:].reshape(1, H))

    gx_r, gx_z, gx_n = jnp.stack(gx_r), jnp.stack(gx_z), jnp.stack(gx_n)  # (D,Tp,B,H)
    whh_r, whh_z, whh_n = jnp.stack(whh_r), jnp.stack(whh_z), jnp.stack(whh_n)
    b_hn = jnp.stack(b_hn)                                                # (D,1,H)

    kernel = functools.partial(
        _gru_recurrence_kernel, seq_len=T, steps_per_block=TT)

    gx_spec = pl.BlockSpec((None, TT, B_pad, H), lambda d, c: (d, c, 0, 0))
    w_spec = pl.BlockSpec((None, H, H), lambda d, c: (d, 0, 0))
    b_spec = pl.BlockSpec((None, 1, H), lambda d, c: (d, 0, 0))

    grid_spec = pltpu.PrefetchScalarGridSpec(
        num_scalar_prefetch=0,
        grid=(D, NT),
        in_specs=[gx_spec, gx_spec, gx_spec, w_spec, w_spec, w_spec, b_spec],
        out_specs=pl.BlockSpec((None, B_pad, H), lambda d, c: (d, 0, 0)),
        scratch_shapes=[pltpu.VMEM((B_pad, H), jnp.float32)],
    )

    out = pl.pallas_call(
        kernel,
        out_shape=jax.ShapeDtypeStruct((D, B_pad, H), jnp.float32),
        grid_spec=grid_spec,
        compiler_params=pltpu.CompilerParams(
            # directions are independent (2 TCs on v7x); time is the recurrence
            dimension_semantics=("parallel", "arbitrary"),
            vmem_limit_bytes=48 * 1024 * 1024,
        ),
    )(gx_r, gx_z, gx_n, whh_r, whh_z, whh_n, b_hn)

    return out[:, :B, :]


def init_gru_params(key, hidden_size, num_features, is_bidirectional=False):
    """Deterministic init matching PyTorch GRU shapes: U(-1/sqrt(H), 1/sqrt(H))."""
    num_dirs = 2 if is_bidirectional else 1
    bound = 1.0 / math.sqrt(hidden_size)
    params = []
    for d in range(num_dirs):
        ks = jax.random.split(jax.random.fold_in(key, d), 4)
        params.append(dict(
            w_ih=jax.random.uniform(ks[0], (3 * hidden_size, num_features),
                                    jnp.float32, -bound, bound),
            w_hh=jax.random.uniform(ks[1], (3 * hidden_size, hidden_size),
                                    jnp.float32, -bound, bound),
            b_ih=jax.random.uniform(ks[2], (3 * hidden_size,),
                                    jnp.float32, -bound, bound),
            b_hh=jax.random.uniform(ks[3], (3 * hidden_size,),
                                    jnp.float32, -bound, bound),
        ))
    return params


@functools.partial(jax.jit, static_argnames=("is_bidirectional", "mxu_dtype"))
def gru_net_forward(x, params, is_bidirectional=False, mxu_dtype=jnp.bfloat16):
    """GRUNet.forward: h_n.squeeze(0) (uni) or h_n.mean(0) (bidirectional)."""
    outs = _gru_final_hidden(x, params, mxu_dtype=mxu_dtype)   # (D, B, H)
    if is_bidirectional:
        return outs.mean(axis=0)
    return outs[0]


def _gru_last_hidden_ref(x, p):
    """Pure-JAX f32 reference (lax.scan) matching PyTorch semantics."""
    x = x.astype(jnp.float32)
    H = p["w_hh"].shape[1]
    wih_t, whh_t = p["w_ih"].T, p["w_hh"].T
    b_ih, b_hh = p["b_ih"], p["b_hh"]

    def step(h, x_t):
        gx = x_t @ wih_t + b_ih
        gh = h @ whh_t + b_hh
        r = jax.nn.sigmoid(gx[:, :H] + gh[:, :H])
        z = jax.nn.sigmoid(gx[:, H:2 * H] + gh[:, H:2 * H])
        n = jnp.tanh(gx[:, 2 * H:] + r * gh[:, 2 * H:])
        return (1.0 - z) * n + z * h, None

    h0 = jnp.zeros((x.shape[0], H), jnp.float32)
    h_last, _ = jax.lax.scan(step, h0, jnp.transpose(x, (1, 0, 2)))
    return h_last


if __name__ == "__main__":
    key = jax.random.PRNGKey(0)
    batch, seq, num_features, hidden_size = 4, 8, 16, 32

    k_x, k_p = jax.random.split(key)
    x = jax.random.normal(k_x, (batch, seq, num_features), jnp.float32)

    # --- unidirectional (module default) ---
    params_uni = init_gru_params(k_p, hidden_size, num_features, False)
    ref_uni = _gru_last_hidden_ref(x, params_uni[0])

    # exact-algorithm check in f32
    out_uni_f32 = jax.block_until_ready(
        gru_net_forward(x, params_uni, is_bidirectional=False,
                        mxu_dtype=jnp.float32))
    assert out_uni_f32.shape == (batch, hidden_size)
    assert jnp.allclose(out_uni_f32, ref_uni, atol=1e-5, rtol=1e-5)

    # default bf16-MXU path (looser tolerance, f32 accumulation keeps it stable)
    out_uni = jax.block_until_ready(
        gru_net_forward(x, params_uni, is_bidirectional=False))
    assert out_uni.shape == (batch, hidden_size)
    assert jnp.allclose(out_uni, ref_uni, atol=5e-2, rtol=5e-2)

    # --- bidirectional variant of the same module ---
    params_bi = init_gru_params(k_p, hidden_size, num_features, True)
    ref_bi = 0.5 * (_gru_last_hidden_ref(x, params_bi[0])
                    + _gru_last_hidden_ref(x[:, ::-1, :], params_bi[1]))

    out_bi_f32 = jax.block_until_ready(
        gru_net_forward(x, params_bi, is_bidirectional=True,
                        mxu_dtype=jnp.float32))
    assert out_bi_f32.shape == (batch, hidden_size)
    assert jnp.allclose(out_bi_f32, ref_bi, atol=1e-5, rtol=1e-5)

    out_bi = jax.block_until_ready(
        gru_net_forward(x, params_bi, is_bidirectional=True))
    assert out_bi.shape == (batch, hidden_size)
    assert jnp.allclose(out_bi, ref_bi, atol=5e-2, rtol=5e-2)

    print("KERNEL_OK")
</pallas_src>

<mosaic_0001>
module attributes {stable_mosaic.version = 11 : i64} {
  func.func @_gru_recurrence_kernel(%arg0: i32, %arg1: i32, %arg2: memref<1x8x8x32xf32, #tpu.memory_space<vmem>>, %arg3: memref<1x8x8x32xf32, #tpu.memory_space<vmem>>, %arg4: memref<1x8x8x32xf32, #tpu.memory_space<vmem>>, %arg5: memref<1x32x32xf32, #tpu.memory_space<vmem>>, %arg6: memref<1x32x32xf32, #tpu.memory_space<vmem>>, %arg7: memref<1x32x32xf32, #tpu.memory_space<vmem>>, %arg8: memref<1x1x32xf32, #tpu.memory_space<vmem>>, %arg9: memref<1x8x32xf32, #tpu.memory_space<vmem>>, %arg10: memref<8x32xf32, #tpu.memory_space<vmem>>) attributes {dimension_semantics = [#tpu.dimension_semantics<parallel>, #tpu.dimension_semantics<arbitrary>], iteration_bounds = array<i64: 1, 1>, scalar_prefetch = 0 : i64, scratch_operands = 1 : i64, tpu.core_type = #tpu.core_type<tc>, window_params = [{transform_indices = @transform_0, window_bounds = array<i64: 1, 8, 8, 32>}, {transform_indices = @transform_1, window_bounds = array<i64: 1, 8, 8, 32>}, {transform_indices = @transform_2, window_bounds = array<i64: 1, 8, 8, 32>}, {transform_indices = @transform_3, window_bounds = array<i64: 1, 32, 32>}, {transform_indices = @transform_4, window_bounds = array<i64: 1, 32, 32>}, {transform_indices = @transform_5, window_bounds = array<i64: 1, 32, 32>}, {transform_indices = @transform_6, window_bounds = array<i64: 1, 1, 32>}, {transform_indices = @transform_7, window_bounds = array<i64: 1, 8, 32>}]} {
    %c0_i32 = arith.constant 0 : i32
    %0 = arith.cmpi eq, %arg1, %c0_i32 : i32
    %1 = arith.extui %0 : i1 to i32
    %c0_i32_0 = arith.constant 0 : i32
    %2 = arith.cmpi ne, %1, %c0_i32_0 : i32
    scf.if %2 {
      %cst_138 = arith.constant 0.000000e+00 : f32
      %288 = vector.broadcast %cst_138 : f32 to vector<8x32xf32>
      %c0_139 = arith.constant 0 : index
      %c0_140 = arith.constant 0 : index
      %289 = vector.load %arg10[%c0_139, %c0_140] : memref<8x32xf32, #tpu.memory_space<vmem>>, vector<8x32xf32>
      tpu.vector_store %arg10[%c0_139, %c0_140], %288 {strides = array<i32>} : memref<8x32xf32, #tpu.memory_space<vmem>>, vector<8x32xf32>,
    } else {
    }
    %c0 = arith.constant 0 : index
    %c0_1 = arith.constant 0 : index
    %c0_2 = arith.constant 0 : index
    %3 = vector.load %arg5[%c0, %c0_1, %c0_2] : memref<1x32x32xf32, #tpu.memory_space<vmem>>, vector<1x32x32xf32>
    %4 = vector.shape_cast %3 : vector<1x32x32xf32> to vector<32x32xf32>
    %c0_3 = arith.constant 0 : index
    %c0_4 = arith.constant 0 : index
    %c0_5 = arith.constant 0 : index
    %5 = vector.load %arg6[%c0_3, %c0_4, %c0_5] : memref<1x32x32xf32, #tpu.memory_space<vmem>>, vector<1x32x32xf32>
    %6 = vector.shape_cast %5 : vector<1x32x32xf32> to vector<32x32xf32>
    %c0_6 = arith.constant 0 : index
    %c0_7 = arith.constant 0 : index
    %c0_8 = arith.constant 0 : index
    %7 = vector.load %arg7[%c0_6, %c0_7, %c0_8] : memref<1x32x32xf32, #tpu.memory_space<vmem>>, vector<1x32x32xf32>
    %8 = vector.shape_cast %7 : vector<1x32x32xf32> to vector<32x32xf32>
    %c0_9 = arith.constant 0 : index
    %c0_10 = arith.constant 0 : index
    %c0_11 = arith.constant 0 : index
    %9 = vector.load %arg8[%c0_9, %c0_10, %c0_11] : memref<1x1x32xf32, #tpu.memory_space<vmem>>, vector<1x1x32xf32>
    %10 = vector.shape_cast %9 : vector<1x1x32xf32> to vector<1x32xf32>
    %c0_12 = arith.constant 0 : index
    %c0_13 = arith.constant 0 : index
    %11 = vector.load %arg10[%c0_12, %c0_13] : memref<8x32xf32, #tpu.memory_space<vmem>>, vector<8x32xf32>
    %c0_i32_14 = arith.constant 0 : i32
    %cst = arith.constant dense<0.000000e+00> : vector<8x32xf32>
    %12 = tpu.matmul %11, %4, %cst {dimension_numbers = #tpu.dot_dimension_numbers<[1], [0], [0], [1], [0, 0, 1, 1], [], []>} : vector<8x32xf32>, vector<32x32xf32>, vector<8x32xf32> -> vector<8x32xf32>
    %cst_15 = arith.constant dense<0.000000e+00> : vector<8x32xf32>
    %13 = tpu.matmul %11, %6, %cst_15 {dimension_numbers = #tpu.dot_dimension_numbers<[1], [0], [0], [1], [0, 0, 1, 1], [], []>} : vector<8x32xf32>, vector<32x32xf32>, vector<8x32xf32> -> vector<8x32xf32>
    %cst_16 = arith.constant dense<0.000000e+00> : vector<8x32xf32>
    %14 = tpu.matmul %11, %8, %cst_16 {dimension_numbers = #tpu.dot_dimension_numbers<[1], [0], [0], [1], [0, 0, 1, 1], [], []>} : vector<8x32xf32>, vector<32x32xf32>, vector<8x32xf32> -> vector<8x32xf32>
    %15 = vector.broadcast %10 : vector<1x32xf32> to vector<8x32xf32>
    %16 = arith.addf %14, %15 : vector<8x32xf32>
    %c0_17 = arith.constant 0 : index
    %17 = arith.index_cast %c0_i32_14 : i32 to index
    %c0_18 = arith.constant 0 : index
    %c0_19 = arith.constant 0 : index
    %18 = vector.load %arg2[%c0_17, %17, %c0_18, %c0_19] : memref<1x8x8x32xf32, #tpu.memory_space<vmem>>, vector<1x1x8x32xf32>
    %19 = vector.shape_cast %18 : vector<1x1x8x32xf32> to vector<8x32xf32>
    %20 = arith.addf %19, %12 : vector<8x32xf32>
    %21 = arith.negf %20 : vector<8x32xf32>
    %22 = math.exp %21 : vector<8x32xf32>
    %cst_20 = arith.constant 1.000000e+00 : f32
    %23 = vector.broadcast %cst_20 : f32 to vector<8x32xf32>
    %24 = arith.addf %23, %22 : vector<8x32xf32>
    %25 = arith.divf %23, %24 : vector<8x32xf32>
    %c0_21 = arith.constant 0 : index
    %26 = arith.index_cast %c0_i32_14 : i32 to index
    %c0_22 = arith.constant 0 : index
    %c0_23 = arith.constant 0 : index
    %27 = vector.load %arg3[%c0_21, %26, %c0_22, %c0_23] : memref<1x8x8x32xf32, #tpu.memory_space<vmem>>, vector<1x1x8x32xf32>
    %28 = vector.shape_cast %27 : vector<1x1x8x32xf32> to vector<8x32xf32>
    %29 = arith.addf %28, %13 : vector<8x32xf32>
    %30 = arith.negf %29 : vector<8x32xf32>
    %31 = math.exp %30 : vector<8x32xf32>
    %cst_24 = arith.constant 1.000000e+00 : f32
    %32 = vector.broadcast %cst_24 : f32 to vector<8x32xf32>
    %33 = arith.addf %32, %31 : vector<8x32xf32>
    %34 = arith.divf %32, %33 : vector<8x32xf32>
    %c0_25 = arith.constant 0 : index
    %35 = arith.index_cast %c0_i32_14 : i32 to index
    %c0_26 = arith.constant 0 : index
    %c0_27 = arith.constant 0 : index
    %36 = vector.load %arg4[%c0_25, %35, %c0_26, %c0_27] : memref<1x8x8x32xf32, #tpu.memory_space<vmem>>, vector<1x1x8x32xf32>
    %37 = vector.shape_cast %36 : vector<1x1x8x32xf32> to vector<8x32xf32>
    %38 = arith.mulf %25, %16 : vector<8x32xf32>
    %39 = arith.addf %37, %38 : vector<8x32xf32>
    %40 = math.tanh %39 : vector<8x32xf32>
    %cst_28 = arith.constant 1.000000e+00 : f32
    %41 = vector.broadcast %cst_28 : f32 to vector<8x32xf32>
    %42 = arith.subf %41, %34 : vector<8x32xf32>
    %43 = arith.mulf %42, %40 : vector<8x32xf32>
    %44 = arith.mulf %34, %11 : vector<8x32xf32>
    %45 = arith.addf %43, %44 : vector<8x32xf32>
    %c1_i32 = arith.constant 1 : i32
    %cst_29 = arith.constant dense<0.000000e+00> : vector<8x32xf32>
    %46 = tpu.matmul %45, %4, %cst_29 {dimension_numbers = #tpu.dot_dimension_numbers<[1], [0], [0], [1], [0, 0, 1, 1], [], []>} : vector<8x32xf32>, vector<32x32xf32>, vector<8x32xf32> -> vector<8x32xf32>
    %cst_30 = arith.constant dense<0.000000e+00> : vector<8x32xf32>
    %47 = tpu.matmul %45, %6, %cst_30 {dimension_numbers = #tpu.dot_dimension_numbers<[1], [0], [0], [1], [0, 0, 1, 1], [], []>} : vector<8x32xf32>, vector<32x32xf32>, vector<8x32xf32> -> vector<8x32xf32>
    %cst_31 = arith.constant dense<0.000000e+00> : vector<8x32xf32>
    %48 = tpu.matmul %45, %8, %cst_31 {dimension_numbers = #tpu.dot_dimension_numbers<[1], [0], [0], [1], [0, 0, 1, 1], [], []>} : vector<8x32xf32>, vector<32x32xf32>, vector<8x32xf32> -> vector<8x32xf32>
    %49 = vector.broadcast %10 : vector<1x32xf32> to vector<8x32xf32>
    %50 = arith.addf %48, %49 : vector<8x32xf32>
    %c0_32 = arith.constant 0 : index
    %51 = arith.index_cast %c1_i32 : i32 to index
    %c0_33 = arith.constant 0 : index
    %c0_34 = arith.constant 0 : index
    %52 = vector.load %arg2[%c0_32, %51, %c0_33, %c0_34] : memref<1x8x8x32xf32, #tpu.memory_space<vmem>>, vector<1x1x8x32xf32>
    %53 = vector.shape_cast %52 : vector<1x1x8x32xf32> to vector<8x32xf32>
    %54 = arith.addf %53, %46 : vector<8x32xf32>
    %55 = arith.negf %54 : vector<8x32xf32>
    %56 = math.exp %55 : vector<8x32xf32>
    %cst_35 = arith.constant 1.000000e+00 : f32
    %57 = vector.broadcast %cst_35 : f32 to vector<8x32xf32>
    %58 = arith.addf %57, %56 : vector<8x32xf32>
    %59 = arith.divf %57, %58 : vector<8x32xf32>
    %c0_36 = arith.constant 0 : index
    %60 = arith.index_cast %c1_i32 : i32 to index
    %c0_37 = arith.constant 0 : index
    %c0_38 = arith.constant 0 : index
    %61 = vector.load %arg3[%c0_36, %60, %c0_37, %c0_38] : memref<1x8x8x32xf32, #tpu.memory_space<vmem>>, vector<1x1x8x32xf32>
    %62 = vector.shape_cast %61 : vector<1x1x8x32xf32> to vector<8x32xf32>
    %63 = arith.addf %62, %47 : vector<8x32xf32>
    %64 = arith.negf %63 : vector<8x32xf32>
    %65 = math.exp %64 : vector<8x32xf32>
    %cst_39 = arith.constant 1.000000e+00 : f32
    %66 = vector.broadcast %cst_39 : f32 to vector<8x32xf32>
    %67 = arith.addf %66, %65 : vector<8x32xf32>
    %68 = arith.divf %66, %67 : vector<8x32xf32>
    %c0_40 = arith.constant 0 : index
    %69 = arith.index_cast %c1_i32 : i32 to index
    %c0_41 = arith.constant 0 : index
    %c0_42 = arith.constant 0 : index
    %70 = vector.load %arg4[%c0_40, %69, %c0_41, %c0_42] : memref<1x8x8x32xf32, #tpu.memory_space<vmem>>, vector<1x1x8x32xf32>
    %71 = vector.shape_cast %70 : vector<1x1x8x32xf32> to vector<8x32xf32>
    %72 = arith.mulf %59, %50 : vector<8x32xf32>
    %73 = arith.addf %71, %72 : vector<8x32xf32>
    %74 = math.tanh %73 : vector<8x32xf32>
    %cst_43 = arith.constant 1.000000e+00 : f32
    %75 = vector.broadcast %cst_43 : f32 to vector<8x32xf32>
    %76 = arith.subf %75, %68 : vector<8x32xf32>
    %77 = arith.mulf %76, %74 : vector<8x32xf32>
    %78 = arith.mulf %68, %45 : vector<8x32xf32>
    %79 = arith.addf %77, %78 : vector<8x32xf32>
    %c2_i32 = arith.constant 2 : i32
    %cst_44 = arith.constant dense<0.000000e+00> : vector<8x32xf32>
    %80 = tpu.matmul %79, %4, %cst_44 {dimension_numbers = #tpu.dot_dimension_numbers<[1], [0], [0], [1], [0, 0, 1, 1], [], []>} : vector<8x32xf32>, vector<32x32xf32>, vector<8x32xf32> -> vector<8x32xf32>
    %cst_45 = arith.constant dense<0.000000e+00> : vector<8x32xf32>
    %81 = tpu.matmul %79, %6, %cst_45 {dimension_numbers = #tpu.dot_dimension_numbers<[1], [0], [0], [1], [0, 0, 1, 1], [], []>} : vector<8x32xf32>, vector<32x32xf32>, vector<8x32xf32> -> vector<8x32xf32>
    %cst_46 = arith.constant dense<0.000000e+00> : vector<8x32xf32>
    %82 = tpu.matmul %79, %8, %cst_46 {dimension_numbers = #tpu.dot_dimension_numbers<[1], [0], [0], [1], [0, 0, 1, 1], [], []>} : vector<8x32xf32>, vector<32x32xf32>, vector<8x32xf32> -> vector<8x32xf32>
    %83 = vector.broadcast %10 : vector<1x32xf32> to vector<8x32xf32>
    %84 = arith.addf %82, %83 : vector<8x32xf32>
    %c0_47 = arith.constant 0 : index
    %85 = arith.index_cast %c2_i32 : i32 to index
    %c0_48 = arith.constant 0 : index
    %c0_49 = arith.constant 0 : index
    %86 = vector.load %arg2[%c0_47, %85, %c0_48, %c0_49] : memref<1x8x8x32xf32, #tpu.memory_space<vmem>>, vector<1x1x8x32xf32>
    %87 = vector.shape_cast %86 : vector<1x1x8x32xf32> to vector<8x32xf32>
    %88 = arith.addf %87, %80 : vector<8x32xf32>
    %89 = arith.negf %88 : vector<8x32xf32>
    %90 = math.exp %89 : vector<8x32xf32>
    %cst_50 = arith.constant 1.000000e+00 : f32
    %91 = vector.broadcast %cst_50 : f32 to vector<8x32xf32>
    %92 = arith.addf %91, %90 : vector<8x32xf32>
    %93 = arith.divf %91, %92 : vector<8x32xf32>
    %c0_51 = arith.constant 0 : index
    %94 = arith.index_cast %c2_i32 : i32 to index
    %c0_52 = arith.constant 0 : index
    %c0_53 = arith.constant 0 : index
    %95 = vector.load %arg3[%c0_51, %94, %c0_52, %c0_53] : memref<1x8x8x32xf32, #tpu.memory_space<vmem>>, vector<1x1x8x32xf32>
    %96 = vector.shape_cast %95 : vector<1x1x8x32xf32> to vector<8x32xf32>
    %97 = arith.addf %96, %81 : vector<8x32xf32>
    %98 = arith.negf %97 : vector<8x32xf32>
    %99 = math.exp %98 : vector<8x32xf32>
    %cst_54 = arith.constant 1.000000e+00 : f32
    %100 = vector.broadcast %cst_54 : f32 to vector<8x32xf32>
    %101 = arith.addf %100, %99 : vector<8x32xf32>
    %102 = arith.divf %100, %101 : vector<8x32xf32>
    %c0_55 = arith.constant 0 : index
    %103 = arith.index_cast %c2_i32 : i32 to index
    %c0_56 = arith.constant 0 : index
    %c0_57 = arith.constant 0 : index
    %104 = vector.load %arg4[%c0_55, %103, %c0_56, %c0_57] : memref<1x8x8x32xf32, #tpu.memory_space<vmem>>, vector<1x1x8x32xf32>
    %105 = vector.shape_cast %104 : vector<1x1x8x32xf32> to vector<8x32xf32>
    %106 = arith.mulf %93, %84 : vector<8x32xf32>
    %107 = arith.addf %105, %106 : vector<8x32xf32>
    %108 = math.tanh %107 : vector<8x32xf32>
    %cst_58 = arith.constant 1.000000e+00 : f32
    %109 = vector.broadcast %cst_58 : f32 to vector<8x32xf32>
    %110 = arith.subf %109, %102 : vector<8x32xf32>
    %111 = arith.mulf %110, %108 : vector<8x32xf32>
    %112 = arith.mulf %102, %79 : vector<8x32xf32>
    %113 = arith.addf %111, %112 : vector<8x32xf32>
    %c3_i32 = arith.constant 3 : i32
    %cst_59 = arith.constant dense<0.000000e+00> : vector<8x32xf32>
    %114 = tpu.matmul %113, %4, %cst_59 {dimension_numbers = #tpu.dot_dimension_numbers<[1], [0], [0], [1], [0, 0, 1, 1], [], []>} : vector<8x32xf32>, vector<32x32xf32>, vector<8x32xf32> -> vector<8x32xf32>
    %cst_60 = arith.constant dense<0.000000e+00> : vector<8x32xf32>
    %115 = tpu.matmul %113, %6, %cst_60 {dimension_numbers = #tpu.dot_dimension_numbers<[1], [0], [0], [1], [0, 0, 1, 1], [], []>} : vector<8x32xf32>, vector<32x32xf32>, vector<8x32xf32> -> vector<8x32xf32>
    %cst_61 = arith.constant dense<0.000000e+00> : vector<8x32xf32>
    %116 = tpu.matmul %113, %8, %cst_61 {dimension_numbers = #tpu.dot_dimension_numbers<[1], [0], [0], [1], [0, 0, 1, 1], [], []>} : vector<8x32xf32>, vector<32x32xf32>, vector<8x32xf32> -> vector<8x32xf32>
    %117 = vector.broadcast %10 : vector<1x32xf32> to vector<8x32xf32>
    %118 = arith.addf %116, %117 : vector<8x32xf32>
    %c0_62 = arith.constant 0 : index
    %119 = arith.index_cast %c3_i32 : i32 to index
    %c0_63 = arith.constant 0 : index
    %c0_64 = arith.constant 0 : index
    %120 = vector.load %arg2[%c0_62, %119, %c0_63, %c0_64] : memref<1x8x8x32xf32, #tpu.memory_space<vmem>>, vector<1x1x8x32xf32>
    %121 = vector.shape_cast %120 : vector<1x1x8x32xf32> to vector<8x32xf32>
    %122 = arith.addf %121, %114 : vector<8x32xf32>
    %123 = arith.negf %122 : vector<8x32xf32>
    %124 = math.exp %123 : vector<8x32xf32>
    %cst_65 = arith.constant 1.000000e+00 : f32
    %125 = vector.broadcast %cst_65 : f32 to vector<8x32xf32>
    %126 = arith.addf %125, %124 : vector<8x32xf32>
    %127 = arith.divf %125, %126 : vector<8x32xf32>
    %c0_66 = arith.constant 0 : index
    %128 = arith.index_cast %c3_i32 : i32 to index
    %c0_67 = arith.constant 0 : index
    %c0_68 = arith.constant 0 : index
    %129 = vector.load %arg3[%c0_66, %128, %c0_67, %c0_68] : memref<1x8x8x32xf32, #tpu.memory_space<vmem>>, vector<1x1x8x32xf32>
    %130 = vector.shape_cast %129 : vector<1x1x8x32xf32> to vector<8x32xf32>
    %131 = arith.addf %130, %115 : vector<8x32xf32>
    %132 = arith.negf %131 : vector<8x32xf32>
    %133 = math.exp %132 : vector<8x32xf32>
    %cst_69 = arith.constant 1.000000e+00 : f32
    %134 = vector.broadcast %cst_69 : f32 to vector<8x32xf32>
    %135 = arith.addf %134, %133 : vector<8x32xf32>
    %136 = arith.divf %134, %135 : vector<8x32xf32>
    %c0_70 = arith.constant 0 : index
    %137 = arith.index_cast %c3_i32 : i32 to index
    %c0_71 = arith.constant 0 : index
    %c0_72 = arith.constant 0 : index
    %138 = vector.load %arg4[%c0_70, %137, %c0_71, %c0_72] : memref<1x8x8x32xf32, #tpu.memory_space<vmem>>, vector<1x1x8x32xf32>
    %139 = vector.shape_cast %138 : vector<1x1x8x32xf32> to vector<8x32xf32>
    %140 = arith.mulf %127, %118 : vector<8x32xf32>
    %141 = arith.addf %139, %140 : vector<8x32xf32>
    %142 = math.tanh %141 : vector<8x32xf32>
    %cst_73 = arith.constant 1.000000e+00 : f32
    %143 = vector.broadcast %cst_73 : f32 to vector<8x32xf32>
    %144 = arith.subf %143, %136 : vector<8x32xf32>
    %145 = arith.mulf %144, %142 : vector<8x32xf32>
    %146 = arith.mulf %136, %113 : vector<8x32xf32>
    %147 = arith.addf %145, %146 : vector<8x32xf32>
    %c4_i32 = arith.constant 4 : i32
    %cst_74 = arith.constant dense<0.000000e+00> : vector<8x32xf32>
    %148 = tpu.matmul %147, %4, %cst_74 {dimension_numbers = #tpu.dot_dimension_numbers<[1], [0], [0], [1], [0, 0, 1, 1], [], []>} : vector<8x32xf32>, vector<32x32xf32>, vector<8x32xf32> -> vector<8x32xf32>
    %cst_75 = arith.constant dense<0.000000e+00> : vector<8x32xf32>
    %149 = tpu.matmul %147, %6, %cst_75 {dimension_numbers = #tpu.dot_dimension_numbers<[1], [0], [0], [1], [0, 0, 1, 1], [], []>} : vector<8x32xf32>, vector<32x32xf32>, vector<8x32xf32> -> vector<8x32xf32>
    %cst_76 = arith.constant dense<0.000000e+00> : vector<8x32xf32>
    %150 = tpu.matmul %147, %8, %cst_76 {dimension_numbers = #tpu.dot_dimension_numbers<[1], [0], [0], [1], [0, 0, 1, 1], [], []>} : vector<8x32xf32>, vector<32x32xf32>, vector<8x32xf32> -> vector<8x32xf32>
    %151 = vector.broadcast %10 : vector<1x32xf32> to vector<8x32xf32>
    %152 = arith.addf %150, %151 : vector<8x32xf32>
    %c0_77 = arith.constant 0 : index
    %153 = arith.index_cast %c4_i32 : i32 to index
    %c0_78 = arith.constant 0 : index
    %c0_79 = arith.constant 0 : index
    %154 = vector.load %arg2[%c0_77, %153, %c0_78, %c0_79] : memref<1x8x8x32xf32, #tpu.memory_space<vmem>>, vector<1x1x8x32xf32>
    %155 = vector.shape_cast %154 : vector<1x1x8x32xf32> to vector<8x32xf32>
    %156 = arith.addf %155, %148 : vector<8x32xf32>
    %157 = arith.negf %156 : vector<8x32xf32>
    %158 = math.exp %157 : vector<8x32xf32>
    %cst_80 = arith.constant 1.000000e+00 : f32
    %159 = vector.broadcast %cst_80 : f32 to vector<8x32xf32>
    %160 = arith.addf %159, %158 : vector<8x32xf32>
    %161 = arith.divf %159, %160 : vector<8x32xf32>
    %c0_81 = arith.constant 0 : index
    %162 = arith.index_cast %c4_i32 : i32 to index
    %c0_82 = arith.constant 0 : index
    %c0_83 = arith.constant 0 : index
    %163 = vector.load %arg3[%c0_81, %162, %c0_82, %c0_83] : memref<1x8x8x32xf32, #tpu.memory_space<vmem>>, vector<1x1x8x32xf32>
    %164 = vector.shape_cast %163 : vector<1x1x8x32xf32> to vector<8x32xf32>
    %165 = arith.addf %164, %149 : vector<8x32xf32>
    %166 = arith.negf %165 : vector<8x32xf32>
    %167 = math.exp %166 : vector<8x32xf32>
    %cst_84 = arith.constant 1.000000e+00 : f32
    %168 = vector.broadcast %cst_84 : f32 to vector<8x32xf32>
    %169 = arith.addf %168, %167 : vector<8x32xf32>
    %170 = arith.divf %168, %169 : vector<8x32xf32>
    %c0_85 = arith.constant 0 : index
    %171 = arith.index_cast %c4_i32 : i32 to index
    %c0_86 = arith.constant 0 : index
    %c0_87 = arith.constant 0 : index
    %172 = vector.load %arg4[%c0_85, %171, %c0_86, %c0_87] : memref<1x8x8x32xf32, #tpu.memory_space<vmem>>, vector<1x1x8x32xf32>
    %173 = vector.shape_cast %172 : vector<1x1x8x32xf32> to vector<8x32xf32>
    %174 = arith.mulf %161, %152 : vector<8x32xf32>
    %175 = arith.addf %173, %174 : vector<8x32xf32>
    %176 = math.tanh %175 : vector<8x32xf32>
    %cst_88 = arith.constant 1.000000e+00 : f32
    %177 = vector.broadcast %cst_88 : f32 to vector<8x32xf32>
    %178 = arith.subf %177, %170 : vector<8x32xf32>
    %179 = arith.mulf %178, %176 : vector<8x32xf32>
    %180 = arith.mulf %170, %147 : vector<8x32xf32>
    %181 = arith.addf %179, %180 : vector<8x32xf32>
    %c5_i32 = arith.constant 5 : i32
    %cst_89 = arith.constant dense<0.000000e+00> : vector<8x32xf32>
    %182 = tpu.matmul %181, %4, %cst_89 {dimension_numbers = #tpu.dot_dimension_numbers<[1], [0], [0], [1], [0, 0, 1, 1], [], []>} : vector<8x32xf32>, vector<32x32xf32>, vector<8x32xf32> -> vector<8x32xf32>
    %cst_90 = arith.constant dense<0.000000e+00> : vector<8x32xf32>
    %183 = tpu.matmul %181, %6, %cst_90 {dimension_numbers = #tpu.dot_dimension_numbers<[1], [0], [0], [1], [0, 0, 1, 1], [], []>} : vector<8x32xf32>, vector<32x32xf32>, vector<8x32xf32> -> vector<8x32xf32>
    %cst_91 = arith.constant dense<0.000000e+00> : vector<8x32xf32>
    %184 = tpu.matmul %181, %8, %cst_91 {dimension_numbers = #tpu.dot_dimension_numbers<[1], [0], [0], [1], [0, 0, 1, 1], [], []>} : vector<8x32xf32>, vector<32x32xf32>, vector<8x32xf32> -> vector<8x32xf32>
    %185 = vector.broadcast %10 : vector<1x32xf32> to vector<8x32xf32>
    %186 = arith.addf %184, %185 : vector<8x32xf32>
    %c0_92 = arith.constant 0 : index
    %187 = arith.index_cast %c5_i32 : i32 to index
    %c0_93 = arith.constant 0 : index
    %c0_94 = arith.constant 0 : index
    %188 = vector.load %arg2[%c0_92, %187, %c0_93, %c0_94] : memref<1x8x8x32xf32, #tpu.memory_space<vmem>>, vector<1x1x8x32xf32>
    %189 = vector.shape_cast %188 : vector<1x1x8x32xf32> to vector<8x32xf32>
    %190 = arith.addf %189, %182 : vector<8x32xf32>
    %191 = arith.negf %190 : vector<8x32xf32>
    %192 = math.exp %191 : vector<8x32xf32>
    %cst_95 = arith.constant 1.000000e+00 : f32
    %193 = vector.broadcast %cst_95 : f32 to vector<8x32xf32>
    %194 = arith.addf %193, %192 : vector<8x32xf32>
    %195 = arith.divf %193, %194 : vector<8x32xf32>
    %c0_96 = arith.constant 0 : index
    %196 = arith.index_cast %c5_i32 : i32 to index
    %c0_97 = arith.constant 0 : index
    %c0_98 = arith.constant 0 : index
    %197 = vector.load %arg3[%c0_96, %196, %c0_97, %c0_98] : memref<1x8x8x32xf32, #tpu.memory_space<vmem>>, vector<1x1x8x32xf32>
    %198 = vector.shape_cast %197 : vector<1x1x8x32xf32> to vector<8x32xf32>
    %199 = arith.addf %198, %183 : vector<8x32xf32>
    %200 = arith.negf %199 : vector<8x32xf32>
    %201 = math.exp %200 : vector<8x32xf32>
    %cst_99 = arith.constant 1.000000e+00 : f32
    %202 = vector.broadcast %cst_99 : f32 to vector<8x32xf32>
    %203 = arith.addf %202, %201 : vector<8x32xf32>
    %204 = arith.divf %202, %203 : vector<8x32xf32>
    %c0_100 = arith.constant 0 : index
    %205 = arith.index_cast %c5_i32 : i32 to index
    %c0_101 = arith.constant 0 : index
    %c0_102 = arith.constant 0 : index
    %206 = vector.load %arg4[%c0_100, %205, %c0_101, %c0_102] : memref<1x8x8x32xf32, #tpu.memory_space<vmem>>, vector<1x1x8x32xf32>
    %207 = vector.shape_cast %206 : vector<1x1x8x32xf32> to vector<8x32xf32>
    %208 = arith.mulf %195, %186 : vector<8x32xf32>
    %209 = arith.addf %207, %208 : vector<8x32xf32>
    %210 = math.tanh %209 : vector<8x32xf32>
    %cst_103 = arith.constant 1.000000e+00 : f32
    %211 = vector.broadcast %cst_103 : f32 to vector<8x32xf32>
    %212 = arith.subf %211, %204 : vector<8x32xf32>
    %213 = arith.mulf %212, %210 : vector<8x32xf32>
    %214 = arith.mulf %204, %181 : vector<8x32xf32>
    %215 = arith.addf %213, %214 : vector<8x32xf32>
    %c6_i32 = arith.constant 6 : i32
    %cst_104 = arith.constant dense<0.000000e+00> : vector<8x32xf32>
    %216 = tpu.matmul %215, %4, %cst_104 {dimension_numbers = #tpu.dot_dimension_numbers<[1], [0], [0], [1], [0, 0, 1, 1], [], []>} : vector<8x32xf32>, vector<32x32xf32>, vector<8x32xf32> -> vector<8x32xf32>
    %cst_105 = arith.constant dense<0.000000e+00> : vector<8x32xf32>
    %217 = tpu.matmul %215, %6, %cst_105 {dimension_numbers = #tpu.dot_dimension_numbers<[1], [0], [0], [1], [0, 0, 1, 1], [], []>} : vector<8x32xf32>, vector<32x32xf32>, vector<8x32xf32> -> vector<8x32xf32>
    %cst_106 = arith.constant dense<0.000000e+00> : vector<8x32xf32>
    %218 = tpu.matmul %215, %8, %cst_106 {dimension_numbers = #tpu.dot_dimension_numbers<[1], [0], [0], [1], [0, 0, 1, 1], [], []>} : vector<8x32xf32>, vector<32x32xf32>, vector<8x32xf32> -> vector<8x32xf32>
    %219 = vector.broadcast %10 : vector<1x32xf32> to vector<8x32xf32>
    %220 = arith.addf %218, %219 : vector<8x32xf32>
    %c0_107 = arith.constant 0 : index
    %221 = arith.index_cast %c6_i32 : i32 to index
    %c0_108 = arith.constant 0 : index
    %c0_109 = arith.constant 0 : index
    %222 = vector.load %arg2[%c0_107, %221, %c0_108, %c0_109] : memref<1x8x8x32xf32, #tpu.memory_space<vmem>>, vector<1x1x8x32xf32>
    %223 = vector.shape_cast %222 : vector<1x1x8x32xf32> to vector<8x32xf32>
    %224 = arith.addf %223, %216 : vector<8x32xf32>
    %225 = arith.negf %224 : vector<8x32xf32>
    %226 = math.exp %225 : vector<8x32xf32>
    %cst_110 = arith.constant 1.000000e+00 : f32
    %227 = vector.broadcast %cst_110 : f32 to vector<8x32xf32>
    %228 = arith.addf %227, %226 : vector<8x32xf32>
    %229 = arith.divf %227, %228 : vector<8x32xf32>
    %c0_111 = arith.constant 0 : index
    %230 = arith.index_cast %c6_i32 : i32 to index
    %c0_112 = arith.constant 0 : index
    %c0_113 = arith.constant 0 : index
    %231 = vector.load %arg3[%c0_111, %230, %c0_112, %c0_113] : memref<1x8x8x32xf32, #tpu.memory_space<vmem>>, vector<1x1x8x32xf32>
    %232 = vector.shape_cast %231 : vector<1x1x8x32xf32> to vector<8x32xf32>
    %233 = arith.addf %232, %217 : vector<8x32xf32>
    %234 = arith.negf %233 : vector<8x32xf32>
    %235 = math.exp %234 : vector<8x32xf32>
    %cst_114 = arith.constant 1.000000e+00 : f32
    %236 = vector.broadcast %cst_114 : f32 to vector<8x32xf32>
    %237 = arith.addf %236, %235 : vector<8x32xf32>
    %238 = arith.divf %236, %237 : vector<8x32xf32>
    %c0_115 = arith.constant 0 : index
    %239 = arith.index_cast %c6_i32 : i32 to index
    %c0_116 = arith.constant 0 : index
    %c0_117 = arith.constant 0 : index
    %240 = vector.load %arg4[%c0_115, %239, %c0_116, %c0_117] : memref<1x8x8x32xf32, #tpu.memory_space<vmem>>, vector<1x1x8x32xf32>
    %241 = vector.shape_cast %240 : vector<1x1x8x32xf32> to vector<8x32xf32>
    %242 = arith.mulf %229, %220 : vector<8x32xf32>
    %243 = arith.addf %241, %242 : vector<8x32xf32>
    %244 = math.tanh %243 : vector<8x32xf32>
    %cst_118 = arith.constant 1.000000e+00 : f32
    %245 = vector.broadcast %cst_118 : f32 to vector<8x32xf32>
    %246 = arith.subf %245, %238 : vector<8x32xf32>
    %247 = arith.mulf %246, %244 : vector<8x32xf32>
    %248 = arith.mulf %238, %215 : vector<8x32xf32>
    %249 = arith.addf %247, %248 : vector<8x32xf32>
    %c7_i32 = arith.constant 7 : i32
    %cst_119 = arith.constant dense<0.000000e+00> : vector<8x32xf32>
    %250 = tpu.matmul %249, %4, %cst_119 {dimension_numbers = #tpu.dot_dimension_numbers<[1], [0], [0], [1], [0, 0, 1, 1], [], []>} : vector<8x32xf32>, vector<32x32xf32>, vector<8x32xf32> -> vector<8x32xf32>
    %cst_120 = arith.constant dense<0.000000e+00> : vector<8x32xf32>
    %251 = tpu.matmul %249, %6, %cst_120 {dimension_numbers = #tpu.dot_dimension_numbers<[1], [0], [0], [1], [0, 0, 1, 1], [], []>} : vector<8x32xf32>, vector<32x32xf32>, vector<8x32xf32> -> vector<8x32xf32>
    %cst_121 = arith.constant dense<0.000000e+00> : vector<8x32xf32>
    %252 = tpu.matmul %249, %8, %cst_121 {dimension_numbers = #tpu.dot_dimension_numbers<[1], [0], [0], [1], [0, 0, 1, 1], [], []>} : vector<8x32xf32>, vector<32x32xf32>, vector<8x32xf32> -> vector<8x32xf32>
    %253 = vector.broadcast %10 : vector<1x32xf32> to vector<8x32xf32>
    %254 = arith.addf %252, %253 : vector<8x32xf32>
    %c0_122 = arith.constant 0 : index
    %255 = arith.index_cast %c7_i32 : i32 to index
    %c0_123 = arith.constant 0 : index
    %c0_124 = arith.constant 0 : index
    %256 = vector.load %arg2[%c0_122, %255, %c0_123, %c0_124] : memref<1x8x8x32xf32, #tpu.memory_space<vmem>>, vector<1x1x8x32xf32>
    %257 = vector.shape_cast %256 : vector<1x1x8x32xf32> to vector<8x32xf32>
    %258 = arith.addf %257, %250 : vector<8x32xf32>
    %259 = arith.negf %258 : vector<8x32xf32>
    %260 = math.exp %259 : vector<8x32xf32>
    %cst_125 = arith.constant 1.000000e+00 : f32
    %261 = vector.broadcast %cst_125 : f32 to vector<8x32xf32>
    %262 = arith.addf %261, %260 : vector<8x32xf32>
    %263 = arith.divf %261, %262 : vector<8x32xf32>
    %c0_126 = arith.constant 0 : index
    %264 = arith.index_cast %c7_i32 : i32 to index
    %c0_127 = arith.constant 0 : index
    %c0_128 = arith.constant 0 : index
    %265 = vector.load %arg3[%c0_126, %264, %c0_127, %c0_128] : memref<1x8x8x32xf32, #tpu.memory_space<vmem>>, vector<1x1x8x32xf32>
    %266 = vector.shape_cast %265 : vector<1x1x8x32xf32> to vector<8x32xf32>
    %267 = arith.addf %266, %251 : vector<8x32xf32>
    %268 = arith.negf %267 : vector<8x32xf32>
    %269 = math.exp %268 : vector<8x32xf32>
    %cst_129 = arith.constant 1.000000e+00 : f32
    %270 = vector.broadcast %cst_129 : f32 to vector<8x32xf32>
    %271 = arith.addf %270, %269 : vector<8x32xf32>
    %272 = arith.divf %270, %271 : vector<8x32xf32>
    %c0_130 = arith.constant 0 : index
    %273 = arith.index_cast %c7_i32 : i32 to index
    %c0_131 = arith.constant 0 : index
    %c0_132 = arith.constant 0 : index
    %274 = vector.load %arg4[%c0_130, %273, %c0_131, %c0_132] : memref<1x8x8x32xf32, #tpu.memory_space<vmem>>, vector<1x1x8x32xf32>
    %275 = vector.shape_cast %274 : vector<1x1x8x32xf32> to vector<8x32xf32>
    %276 = arith.mulf %263, %254 : vector<8x32xf32>
    %277 = arith.addf %275, %276 : vector<8x32xf32>
    %278 = math.tanh %277 : vector<8x32xf32>
    %cst_133 = arith.constant 1.000000e+00 : f32
    %279 = vector.broadcast %cst_133 : f32 to vector<8x32xf32>
    %280 = arith.subf %279, %272 : vector<8x32xf32>
    %281 = arith.mulf %280, %278 : vector<8x32xf32>
    %282 = arith.mulf %272, %249 : vector<8x32xf32>
    %283 = arith.addf %281, %282 : vector<8x32xf32>
    %c8_i32 = arith.constant 8 : i32
    %c0_134 = arith.constant 0 : index
    %c0_135 = arith.constant 0 : index
    %284 = vector.load %arg10[%c0_134, %c0_135] : memref<8x32xf32, #tpu.memory_space<vmem>>, vector<8x32xf32>
    tpu.vector_store %arg10[%c0_134, %c0_135], %283 {strides = array<i32>} : memref<8x32xf32, #tpu.memory_space<vmem>>, vector<8x32xf32>,
    %c0_i32_136 = arith.constant 0 : i32
    %285 = arith.cmpi eq, %arg1, %c0_i32_136 : i32
    %286 = arith.extui %285 : i1 to i32
    %c0_i32_137 = arith.constant 0 : i32
    %287 = arith.cmpi ne, %286, %c0_i32_137 : i32
    scf.if %287 {
      %c0_138 = arith.constant 0 : index
      %c0_139 = arith.constant 0 : index
      %c0_140 = arith.constant 0 : index
      %288 = vector.load %arg9[%c0_138, %c0_139, %c0_140] : memref<1x8x32xf32, #tpu.memory_space<vmem>>, vector<1x8x32xf32>
      %289 = vector.shape_cast %288 : vector<1x8x32xf32> to vector<8x32xf32>
      %290 = vector.shape_cast %283 : vector<8x32xf32> to vector<1x8x32xf32>
      tpu.vector_store %arg9[%c0_138, %c0_139, %c0_140], %290 {strides = array<i32>} : memref<1x8x32xf32, #tpu.memory_space<vmem>>, vector<1x8x32xf32>,
    } else {
    }
    return
  }
  func.func @transform_0(%arg0: i32, %arg1: i32) -> (i32, i32, i32, i32) {
    %c0_i32 = arith.constant 0 : i32
    %c0_i32_0 = arith.constant 0 : i32
    %c0_i32_1 = arith.constant 0 : i32
    return %arg0, %arg1, %c0_i32, %c0_i32_0 : i32, i32, i32, i32
  }
  func.func @transform_1(%arg0: i32, %arg1: i32) -> (i32, i32, i32, i32) {
    %c0_i32 = arith.constant 0 : i32
    %c0_i32_0 = arith.constant 0 : i32
    %c0_i32_1 = arith.constant 0 : i32
    return %arg0, %arg1, %c0_i32, %c0_i32_0 : i32, i32, i32, i32
  }
  func.func @transform_2(%arg0: i32, %arg1: i32) -> (i32, i32, i32, i32) {
    %c0_i32 = arith.constant 0 : i32
    %c0_i32_0 = arith.constant 0 : i32
    %c0_i32_1 = arith.constant 0 : i32
    return %arg0, %arg1, %c0_i32, %c0_i32_0 : i32, i32, i32, i32
  }
  func.func @transform_3(%arg0: i32, %arg1: i32) -> (i32, i32, i32) {
    %c0_i32 = arith.constant 0 : i32
    %c0_i32_0 = arith.constant 0 : i32
    %c0_i32_1 = arith.constant 0 : i32
    return %arg0, %c0_i32, %c0_i32_0 : i32, i32, i32
  }
  func.func @transform_4(%arg0: i32, %arg1: i32) -> (i32, i32, i32) {
    %c0_i32 = arith.constant 0 : i32
    %c0_i32_0 = arith.constant 0 : i32
    %c0_i32_1 = arith.constant 0 : i32
    return %arg0, %c0_i32, %c0_i32_0 : i32, i32, i32
  }
  func.func @transform_5(%arg0: i32, %arg1: i32) -> (i32, i32, i32) {
    %c0_i32 = arith.constant 0 : i32
    %c0_i32_0 = arith.constant 0 : i32
    %c0_i32_1 = arith.constant 0 : i32
    return %arg0, %c0_i32, %c0_i32_0 : i32, i32, i32
  }
  func.func @transform_6(%arg0: i32, %arg1: i32) -> (i32, i32, i32) {
    %c0_i32 = arith.constant 0 : i32
    %c0_i32_0 = arith.constant 0 : i32
    %c0_i32_1 = arith.constant 0 : i32
    return %arg0, %c0_i32, %c0_i32_0 : i32, i32, i32
  }
  func.func @transform_7(%arg0: i32, %arg1: i32) -> (i32, i32, i32) {
    %c0_i32 = arith.constant 0 : i32
    %c0_i32_0 = arith.constant 0 : i32
    %c0_i32_1 = arith.constant 0 : i32
    return %arg0, %c0_i32, %c0_i32_0 : i32, i32, i32
  }
}

</mosaic_0001>

<bundles_post_ra>
// kernel: gru_net_forward.1
= control target key start
LH: loop header
LB: loop body
LE: loop exit
PB: predicated region body
PF: predicated region fallthrough
CT: control target
= control target key end

     0   :  { %vm30_vm0 = vcmask 261120   ;;  %v1127_v3 = vmov 0.0   ;;  %s1469_s3 = inlined_call_operand.vmem [shape: f32[1,32,32], index: 3, kind: input, shape index: {}]   ;;  %s1470_s4 = inlined_call_operand.vmem [shape: f32[1,32,32], index: 4, kind: input, shape index: {}]   ;;  %s1471_s5 = inlined_call_operand.vmem [shape: f32[1,32,32], index: 5, kind: input, shape index: {}]   ;;  %s1472_s6 = inlined_call_operand.vmem [shape: f32[1,1,32], index: 6, kind: input, shape index: {}]   ;;  %s1473_s0 = inlined_call_operand.vmem [shape: f32[1,8,8,32], index: 0, kind: input, shape index: {}]   ;;  %s1474_s1 = inlined_call_operand.vmem [shape: f32[1,8,8,32], index: 1, kind: input, shape index: {}]   ;;  %s1475_s2 = inlined_call_operand.vmem [shape: f32[1,8,8,32], index: 2, kind: input, shape index: {}]   ;;  %s1476_s7 = inlined_call_operand.vmem [shape: f32[1,8,32], index: 7, kind: output, shape index: {}]  }
   0x1   :  { %v1171_v0 = vld [vmem:[%s1469_s3 + $0x18] sm:$0xff]  ;;  %v1181_v2 = vld [vmem:[%s1469_s3 + $0x10] sm:$0xff]  ;;  %31 = vst.msk [vmem:[#allocation2] sm:$0xff] %vm30_vm0, %v1127_v3  ;;  %v1194_v5 = vld [vmem:[%s1469_s3 + $0x8] sm:$0xff] }
   0x2   :  { %v1176_v1 = vld [vmem:[%s1470_s4 + $0x18] sm:$0xff]  ;;  %62 = vmatpush.msra.mxu0 %v1171_v0  ;;  %v1189_v4 = vld [vmem:[%s1470_s4 + $0x10] sm:$0xff]  ;;  %v1199_v6 = vld [vmem:[%s1470_s4 + $0x8] sm:$0xff]  ;;  %178 = vmatpush.msra.mxu3 %v1171_v0 }
   0x3   :  { %82 = vmatpush.msra.mxu1 %v1176_v1  ;;  %v1204_v7 = vld [vmem:[%s1471_s5 + $0x18] sm:$0xff]  ;;  %v1212_v8 = vld [vmem:[%s1471_s5 + $0x10] sm:$0xff]  ;;  %v1217_v9 = vld [vmem:[%s1469_s3] sm:$0xff] }
   0x4   :  { %63 = vmatpush.msra.mxu0 %v1181_v2  ;;  %v1222_v10 = vld [vmem:[%s1470_s4] sm:$0xff]  ;;  %105 = vmatpush.msra.mxu2 %v1204_v7  ;;  %v1232_v11 = vld [vmem:[%s1471_s5 + $0x8] sm:$0xff] }
   0x5   :  { %83 = vmatpush.msra.mxu1 %v1189_v4  ;;  %179 = vmatpush.msra.mxu3 %v1181_v2  ;;  %v1246_v13 = vld [vmem:[%s1471_s5] sm:$0xff]  ;;  %v994_v57 = vld [vmem:[%s1474_s1 + $0x8] sm:$0xff] }
   0x6   :  { %64 = vmatpush.msra.mxu0 %v1194_v5  ;;  %106 = vmatpush.msra.mxu2 %v1212_v8  ;;  %v113_v14 = vld [vmem:[%s1473_s0] sm:$0xff]  ;;  %v992_v61 = vld [vmem:[%s1473_s0 + $0x8] sm:$0xff] }
   0x7   :  { %84 = vmatpush.msra.mxu1 %v1199_v6  ;;  %180 = vmatpush.msra.mxu3 %v1194_v5  ;;  %v134_v15 = vld [vmem:[%s1474_s1] sm:$0xff] }
   0x8   :  { %65 = vmatpush.msra.mxu0 %v1217_v9  ;;  %v1237_v12 = vld [vmem:[#allocation2] sm:$0xff]  ;;  %107 = vmatpush.msra.mxu2 %v1232_v11 }
   0x9   :  { %85 = vmatpush.msra.mxu1 %v1222_v10  ;;  %984 = vmatmul.msk.f32.vlgmr.msra.gmra.mxu0 %vm30_vm0, %v1237_v12  ;;  %v1290_v30 = vld [vmem:[%s1472_s6] ss:$0 sm:$0xff] }
   0xa   :  { %985 = vmatmul.msk.f32.vlgmr.msra.gmra.mxu1 %vm30_vm0, %v1237_v12  ;;  %198 = vmatpush.msrb.mxu0 %v1176_v1  ;;  %v155_v43 = vld [vmem:[%s1475_s2] sm:$0xff] }
   0xb   :  { %218 = vmatpush.msrb.mxu1 %v1204_v7  ;;  %181 = vmatpush.msra.mxu3 %v1217_v9 }
   0xc   :  { %108 = vmatpush.msra.mxu2 %v1246_v13  ;;  %199 = vmatpush.msrb.mxu0 %v1189_v4 }
   0xd   :  { %986 = vmatmul.msk.f32.vlgmr.msra.gmra.mxu2 %vm30_vm0, %v1237_v12  ;;  %219 = vmatpush.msrb.mxu1 %v1212_v8 }
   0xe   :  { %200 = vmatpush.msrb.mxu0 %v1199_v6  ;;  %294 = vmatpush.msrb.mxu2 %v1171_v0 }
   0xf   :  { %220 = vmatpush.msrb.mxu1 %v1232_v11  ;;  %314 = vmatpush.msrb.mxu3 %v1176_v1 }
  0x10   :  { %201 = vmatpush.msrb.mxu0 %v1222_v10  ;;  %295 = vmatpush.msrb.mxu2 %v1181_v2 }
  0x11   :  { %221 = vmatpush.msrb.mxu1 %v1246_v13  ;;  %315 = vmatpush.msrb.mxu3 %v1189_v4 }
  0x12   :  { %334 = vmatpush.msra.mxu0 %v1204_v7  ;;  %296 = vmatpush.msrb.mxu2 %v1194_v5 }
  0x13   :  { %410 = vmatpush.msra.mxu1 %v1171_v0  ;;  %316 = vmatpush.msrb.mxu3 %v1199_v6 }
  0x14   :  { %335 = vmatpush.msra.mxu0 %v1212_v8  ;;  %297 = vmatpush.msrb.mxu2 %v1217_v9 }
  0x15   :  { %317 = vmatpush.msrb.mxu3 %v1222_v10  ;;  %411 = vmatpush.msra.mxu1 %v1181_v2 }
  0x16   :  { %336 = vmatpush.msra.mxu0 %v1232_v11  ;;  %430 = vmatpush.msra.mxu2 %v1176_v1 }
  0x17   :  { %412 = vmatpush.msra.mxu1 %v1194_v5 }
  0x18   :  { %337 = vmatpush.msra.mxu0 %v1246_v13  ;;  %431 = vmatpush.msra.mxu2 %v1189_v4 }
  0x19   :  { %413 = vmatpush.msra.mxu1 %v1217_v9 }
  0x1a   :  { %432 = vmatpush.msra.mxu2 %v1199_v6 }
  0x1c   :  { %433 = vmatpush.msra.mxu2 %v1222_v10 }
  0x86   :  { %v67_v16 = vpop.f32.mrf.mxu0 }
  0x87   :  { %v87_v17 = vpop.f32.mrf.mxu1  ;;  %v114_v18 = vadd.f32 %v113_v14, %v67_v16 }
  0x88   :  { %v135_v19 = vadd.f32 %v134_v15, %v87_v17 }
  0x89   :  { %v987_v20 = vmul.f32 -1.442695, %v114_v18 }
  0x8a   :  { %v988_v21 = vmul.f32 -1.442695, %v135_v19 }
  0x8b   :  { %1047 = vpow2.f32 %v987_v20 }
  0x8c   :  { %1049 = vpow2.f32 %v988_v21 }
  0x90   :  { %v110_v33 = vpop.f32.mrf.mxu2 }
  0x91   :  { %v1048_v22 = vpop.eup %1047  ;;  %v111_v38 = vadd.f32 %v1290_v30, %v110_v33 }
  0x92   :  { %v1050_v23 = vpop.eup %1049  ;;  %v118_v24 = vadd.f32 1.0, %v1048_v22 }
  0x93   :  { %v139_v25 = vadd.f32 1.0, %v1050_v23 }
  0x94   :  { %1051 = vrcp.f32 %v118_v24  ;;  %v130_v34 = vand.u32 2147483648, %v118_v24  ;;  %v128_v36 = vand.u32 2147483647, %v118_v24  ;;  %vm124_vm2 = vweird.f32 %v118_v24 }
  0x95   :  { %1053 = vrcp.f32 %v139_v25  ;;  %vm145_vm5 = vweird.f32 %v139_v25  ;;  %v151_v46 = vand.u32 2147483648, %v139_v25  ;;  %v149_v47 = vand.u32 2147483647, %v139_v25 }
  0x96   :  { %v131_v40 = vor.u32 1.1754944e-38, %v130_v34  ;;  %vm129_vm4 = vcmp.eq.f32.partialorder %v128_v36, 8.507059e+37 }
  0x97   :  { %v152_v50 = vor.u32 1.1754944e-38, %v151_v46  ;;  %vm150_vm8 = vcmp.eq.f32.partialorder %v149_v47, 8.507059e+37 }
  0x9a   :  { %v1052_v26 = vpop.eup %1051 }
  0x9b   :  { %v1054_v27 = vpop.eup %1053  ;;  %v120_v28 = vmul.f32 %v1052_v26, %v118_v24  ;;  %vm125_vm1 = vweird.f32 %v1052_v26 }
  0x9c   :  { %v141_v29 = vmul.f32 %v1054_v27, %v139_v25  ;;  %vm126_vm3 = vmor %vm124_vm2, %vm125_vm1  ;;  %vm146_vm6 = vweird.f32 %v1054_v27 }
  0x9d   :  { %v121_v31 = vsub.f32 1.0, %v120_v28  ;;  %vm147_vm7 = vmor %vm145_vm5, %vm146_vm6 }
  0x9e   :  { %v142_v32 = vsub.f32 1.0, %v141_v29 }
  0x9f   :  { %v122_v35 = vmul.f32 %v1052_v26, %v121_v31 }
  0xa0   :  { %v143_v37 = vmul.f32 %v1054_v27, %v142_v32 }
  0xa1   :  { %v123_v39 = vadd.f32 %v1052_v26, %v122_v35  ;;  %v996_v35 = vld [vmem:[%s1475_s2 + $0x8] sm:$0xff] }
  0xa2   :  { %v144_v44 = vadd.f32 %v1054_v27, %v143_v37 }
  0xa3   :  { %v127_v41 = vsel %vm126_vm3, %v1052_v26, %v123_v39 }
  0xa4   :  { %v132_v42 = vsel %vm129_vm4, %v131_v40, %v127_v41  ;;  %v148_v49 = vsel %vm147_vm7, %v1054_v27, %v144_v44 }
  0xa5   :  { %v156_v45 = vmul.f32 %v132_v42, %v111_v38  ;;  %v153_v51 = vsel %vm150_vm8, %v152_v50, %v148_v49  ;;  %v1002_v49 = vld [vmem:[%s1474_s1 + $0x10] sm:$0xff] }
  0xa6   :  { %v159_v52 = vsub.f32 1.0, %v153_v51  ;;  %v161_v55 = vmul.f32 %v153_v51, %v1237_v12 }
  0xa7   :  { %v157_v48 = vadd.f32 %v156_v45, %v155_v43 }
  0xa9   :  { %1055 = vtanh.f32 %v157_v48  ;;  %v1000_v48 = vld [vmem:[%s1473_s0 + $0x10] sm:$0xff] }
  0xaf   :  { %v1056_v53 = vpop.eup %1055 }
  0xb0   :  { %v160_v54 = vmul.f32 %v1056_v53, %v159_v52 }
  0xb2   :  { %v1297_v56 = vadd.f32 %v161_v55, %v160_v54 }
  0xb4   :  { %989 = vmatmul.msk.f32.vlgmr.msra.gmra.mxu3 %vm30_vm0, %v1297_v56  ;;  %990 = vmatmul.msk.f32.vlgmr.msrb.gmra.mxu0 %vm30_vm0, %v1297_v56 }
  0xb5   :  { %991 = vmatmul.msk.f32.vlgmr.msrb.gmra.mxu1 %vm30_vm0, %v1297_v56  ;;  %450 = vmatpush.msra.mxu3 %v1204_v7 }
  0xb6   :  { %526 = vmatpush.msrb.mxu0 %v1171_v0  ;;  %546 = vmatpush.msrb.mxu1 %v1176_v1 }
  0xb7   :  { %451 = vmatpush.msra.mxu3 %v1212_v8 }
  0xb8   :  { %527 = vmatpush.msrb.mxu0 %v1181_v2  ;;  %547 = vmatpush.msrb.mxu1 %v1189_v4 }
  0xb9   :  { %452 = vmatpush.msra.mxu3 %v1232_v11 }
  0xba   :  { %528 = vmatpush.msrb.mxu0 %v1194_v5  ;;  %548 = vmatpush.msrb.mxu1 %v1199_v6 }
  0xbb   :  { %453 = vmatpush.msra.mxu3 %v1246_v13 }
  0xbc   :  { %529 = vmatpush.msrb.mxu0 %v1217_v9  ;;  %549 = vmatpush.msrb.mxu1 %v1222_v10 }
 0x131   :  { %v203_v58 = vpop.f32.mrf.mxu0 }
 0x132   :  { %v250_v59 = vadd.f32 %v994_v57, %v203_v58  ;;  %v223_v27 = vpop.f32.mrf.mxu1 }
 0x133   :  { %v224_v31 = vadd.f32 %v1290_v30, %v223_v27 }
 0x134   :  { %v995_v60 = vmul.f32 -1.442695, %v250_v59 }
 0x136   :  { %1057 = vpow2.f32 %v995_v60 }
 0x137   :  { %v183_v62 = vpop.f32.mrf.mxu3 }
 0x138   :  { %v228_v63 = vadd.f32 %v992_v61, %v183_v62 }
 0x13a   :  { %v993_v3 = vmul.f32 -1.442695, %v228_v63 }
 0x13c   :  { %v1058_v12 = vpop.eup %1057  ;;  %1059 = vpow2.f32 %v993_v3 }
 0x13d   :  { %v254_v14 = vadd.f32 1.0, %v1058_v12 }
 0x13f   :  { %1061 = vrcp.f32 %v254_v14  ;;  %v266_v36 = vand.u32 2147483648, %v254_v14  ;;  %vm260_vm14 = vweird.f32 %v254_v14  ;;  %v264_v38 = vand.u32 2147483647, %v254_v14 }
 0x141   :  { %v267_v41 = vor.u32 1.1754944e-38, %v266_v36  ;;  %vm265_vm1 = vcmp.eq.f32.partialorder %v264_v38, 8.507059e+37 }
 0x142   :  { %v1060_v15 = vpop.eup %1059 }
 0x143   :  { %v232_v16 = vadd.f32 1.0, %v1060_v15 }
 0x145   :  { %1063 = vrcp.f32 %v232_v16  ;;  %v1062_v17 = vpop.eup %1061  ;;  %v244_v23 = vand.u32 2147483648, %v232_v16  ;;  %v242_v25 = vand.u32 2147483647, %v232_v16  ;;  %vm238_vm10 = vweird.f32 %v232_v16 }
 0x146   :  { %v256_v18 = vmul.f32 %v1062_v17, %v254_v14  ;;  %vm261_vm13 = vweird.f32 %v1062_v17 }
 0x147   :  { %v245_v29 = vor.u32 1.1754944e-38, %v244_v23  ;;  %vm243_vm12 = vcmp.eq.f32.partialorder %v242_v25, 8.507059e+37  ;;  %vm262_vm15 = vmor %vm260_vm14, %vm261_vm13  ;;  %v1004_v25 = vld [vmem:[%s1475_s2 + $0x10] sm:$0xff] }
 0x148   :  { %v257_v21 = vsub.f32 1.0, %v256_v18 }
 0x14a   :  { %v258_v26 = vmul.f32 %v1062_v17, %v257_v21 }
 0x14b   :  { %v1064_v19 = vpop.eup %1063 }
 0x14c   :  { %v234_v20 = vmul.f32 %v1064_v19, %v232_v16  ;;  %vm239_vm9 = vweird.f32 %v1064_v19  ;;  %v259_v34 = vadd.f32 %v1062_v17, %v258_v26 }
 0x14d   :  { %vm240_vm11 = vmor %vm238_vm10, %vm239_vm9 }
 0x14e   :  { %v235_v22 = vsub.f32 1.0, %v234_v20  ;;  %v263_v40 = vsel %vm262_vm15, %v1062_v17, %v259_v34 }
 0x14f   :  { %v268_v42 = vsel %vm265_vm1, %v267_v41, %v263_v40 }
 0x150   :  { %v236_v24 = vmul.f32 %v1064_v19, %v235_v22  ;;  %v275_v43 = vsub.f32 1.0, %v268_v42  ;;  %v277_v46 = vmul.f32 %v268_v42, %v1297_v56 }
 0x152   :  { %v237_v28 = vadd.f32 %v1064_v19, %v236_v24 }
 0x154   :  { %v241_v32 = vsel %vm240_vm11, %v1064_v19, %v237_v28 }
 0x155   :  { %v246_v33 = vsel %vm243_vm12, %v245_v29, %v241_v32 }
 0x156   :  { %v272_v37 = vmul.f32 %v246_v33, %v224_v31 }
 0x158   :  { %v273_v39 = vadd.f32 %v996_v35, %v272_v37 }
 0x15a   :  { %1065 = vtanh.f32 %v273_v39  ;;  %v1008_v39 = vld [vmem:[%s1473_s0 + $0x18] sm:$0xff] }
 0x160   :  { %v1066_v44 = vpop.eup %1065 }
 0x161   :  { %v276_v45 = vmul.f32 %v1066_v44, %v275_v43  ;;  %v1010_v43 = vld [vmem:[%s1474_s1 + $0x18] sm:$0xff] }
 0x163   :  { %v1328_v47 = vadd.f32 %v277_v46, %v276_v45 }
 0x165   :  { %997 = vmatmul.msk.f32.vlgmr.msrb.gmra.mxu2 %vm30_vm0, %v1328_v47  ;;  %998 = vmatmul.msk.f32.vlgmr.msrb.gmra.mxu3 %vm30_vm0, %v1328_v47 }
 0x166   :  { %999 = vmatmul.msk.f32.vlgmr.msra.gmra.mxu0 %vm30_vm0, %v1328_v47  ;;  %566 = vmatpush.msrb.mxu2 %v1204_v7 }
 0x167   :  { %642 = vmatpush.msrb.mxu3 %v1171_v0  ;;  %662 = vmatpush.msra.mxu0 %v1176_v1 }
 0x168   :  { %567 = vmatpush.msrb.mxu2 %v1212_v8 }
 0x169   :  { %643 = vmatpush.msrb.mxu3 %v1181_v2  ;;  %663 = vmatpush.msra.mxu0 %v1189_v4 }
 0x16a   :  { %568 = vmatpush.msrb.mxu2 %v1232_v11 }
 0x16b   :  { %644 = vmatpush.msrb.mxu3 %v1194_v5  ;;  %664 = vmatpush.msra.mxu0 %v1199_v6 }
 0x16c   :  { %569 = vmatpush.msrb.mxu2 %v1246_v13 }
 0x16d   :  { %645 = vmatpush.msrb.mxu3 %v1217_v9  ;;  %665 = vmatpush.msra.mxu0 %v1222_v10 }
 0x1e3   :  { %v339_v17 = vpop.f32.mrf.mxu0 }
 0x1e4   :  { %v340_v21 = vadd.f32 %v1290_v30, %v339_v17 }
 0x1e8   :  { %v299_v50 = vpop.f32.mrf.mxu2  ;;  %v319_v51 = vpop.f32.mrf.mxu3 }
 0x1e9   :  { %v344_v52 = vadd.f32 %v1000_v48, %v299_v50  ;;  %v366_v53 = vadd.f32 %v1002_v49, %v319_v51 }
 0x1eb   :  { %v1001_v54 = vmul.f32 -1.442695, %v344_v52  ;;  %v1003_v55 = vmul.f32 -1.442695, %v366_v53 }
 0x1ed   :  { %1067 = vpow2.f32 %v1001_v54 }
 0x1ee   :  { %1069 = vpow2.f32 %v1003_v55 }
 0x1f3   :  { %v1068_v56 = vpop.eup %1067 }
 0x1f4   :  { %v1070_v57 = vpop.eup %1069  ;;  %v348_v58 = vadd.f32 1.0, %v1068_v56 }
 0x1f5   :  { %v370_v59 = vadd.f32 1.0, %v1070_v57 }
 0x1f6   :  { %1071 = vrcp.f32 %v348_v58  ;;  %v360_v12 = vand.u32 2147483648, %v348_v58  ;;  %v358_v16 = vand.u32 2147483647, %v348_v58  ;;  %vm354_vm3 = vweird.f32 %v348_v58 }
 0x1f7   :  { %1073 = vrcp.f32 %v370_v59  ;;  %v382_v27 = vand.u32 2147483648, %v370_v59  ;;  %vm376_vm7 = vweird.f32 %v370_v59  ;;  %v380_v28 = vand.u32 2147483647, %v370_v59 }
 0x1f8   :  { %v361_v20 = vor.u32 1.1754944e-38, %v360_v12  ;;  %vm359_vm5 = vcmp.eq.f32.partialorder %v358_v16, 8.507059e+37 }
 0x1f9   :  { %v383_v32 = vor.u32 1.1754944e-38, %v382_v27  ;;  %vm381_vm9 = vcmp.eq.f32.partialorder %v380_v28, 8.507059e+37 }
 0x1fc   :  { %v1072_v60 = vpop.eup %1071 }
 0x1fd   :  { %v1074_v61 = vpop.eup %1073  ;;  %v350_v62 = vmul.f32 %v1072_v60, %v348_v58  ;;  %vm355_vm2 = vweird.f32 %v1072_v60 }
 0x1fe   :  { %v372_v63 = vmul.f32 %v1074_v61, %v370_v59  ;;  %vm356_vm4 = vmor %vm354_vm3, %vm355_vm2  ;;  %vm377_vm6 = vweird.f32 %v1074_v61 }
 0x1ff   :  { %v351_v3 = vsub.f32 1.0, %v350_v62  ;;  %vm378_vm8 = vmor %vm376_vm7, %vm377_vm6 }
 0x200   :  { %v373_v14 = vsub.f32 1.0, %v372_v63 }
 0x201   :  { %v352_v15 = vmul.f32 %v1072_v60, %v351_v3 }
 0x202   :  { %v374_v18 = vmul.f32 %v1074_v61, %v373_v14  ;;  %v1012_v14 = vld [vmem:[%s1475_s2 + $0x18] sm:$0xff] }
 0x203   :  { %v353_v19 = vadd.f32 %v1072_v60, %v352_v15 }
 0x204   :  { %v375_v24 = vadd.f32 %v1074_v61, %v374_v18 }
 0x205   :  { %v357_v22 = vsel %vm356_vm4, %v1072_v60, %v353_v19 }
 0x206   :  { %v362_v23 = vsel %vm359_vm5, %v361_v20, %v357_v22  ;;  %v379_v31 = vsel %vm378_vm8, %v1074_v61, %v375_v24 }
 0x207   :  { %v388_v26 = vmul.f32 %v362_v23, %v340_v21  ;;  %v384_v33 = vsel %vm381_vm9, %v383_v32, %v379_v31 }
 0x208   :  { %v391_v34 = vsub.f32 1.0, %v384_v33  ;;  %v393_v37 = vmul.f32 %v384_v33, %v1328_v47 }
 0x209   :  { %v389_v29 = vadd.f32 %v1004_v25, %v388_v26 }
 0x20b   :  { %1075 = vtanh.f32 %v389_v29 }
 0x211   :  { %v1076_v35 = vpop.eup %1075 }
 0x212   :  { %v392_v36 = vmul.f32 %v1076_v35, %v391_v34 }
 0x214   :  { %v1359_v38 = vadd.f32 %v393_v37, %v392_v36 }
 0x216   :  { %1005 = vmatmul.msk.f32.vlgmr.msra.gmra.mxu1 %vm30_vm0, %v1359_v38  ;;  %1006 = vmatmul.msk.f32.vlgmr.msra.gmra.mxu2 %vm30_vm0, %v1359_v38 }
 0x217   :  { %1007 = vmatmul.msk.f32.vlgmr.msra.gmra.mxu3 %vm30_vm0, %v1359_v38  ;;  %682 = vmatpush.msra.mxu1 %v1204_v7 }
 0x218   :  { %758 = vmatpush.msra.mxu2 %v1171_v0  ;;  %778 = vmatpush.msra.mxu3 %v1176_v1 }
 0x219   :  { %683 = vmatpush.msra.mxu1 %v1212_v8 }
 0x21a   :  { %759 = vmatpush.msra.mxu2 %v1181_v2  ;;  %779 = vmatpush.msra.mxu3 %v1189_v4 }
 0x21b   :  { %684 = vmatpush.msra.mxu1 %v1232_v11 }
 0x21c   :  { %760 = vmatpush.msra.mxu2 %v1194_v5  ;;  %780 = vmatpush.msra.mxu3 %v1199_v6 }
 0x21d   :  { %685 = vmatpush.msra.mxu1 %v1246_v13 }
 0x21e   :  { %761 = vmatpush.msra.mxu2 %v1217_v9  ;;  %781 = vmatpush.msra.mxu3 %v1222_v10 }
 0x293   :  { %v415_v40 = vpop.f32.mrf.mxu1 }
 0x294   :  { %v460_v41 = vadd.f32 %v1008_v39, %v415_v40 }
 0x296   :  { %v1009_v42 = vmul.f32 -1.442695, %v460_v41 }
 0x298   :  { %1077 = vpow2.f32 %v1009_v42 }
 0x299   :  { %v435_v44 = vpop.f32.mrf.mxu2 }
 0x29a   :  { %v482_v45 = vadd.f32 %v1010_v43, %v435_v44  ;;  %v455_v58 = vpop.f32.mrf.mxu3 }
 0x29b   :  { %v456_v63 = vadd.f32 %v1290_v30, %v455_v58 }
 0x29c   :  { %v1011_v46 = vmul.f32 -1.442695, %v482_v45 }
 0x29e   :  { %v1078_v47 = vpop.eup %1077  ;;  %1079 = vpow2.f32 %v1011_v46 }
 0x29f   :  { %v464_v48 = vadd.f32 1.0, %v1078_v47 }
 0x2a1   :  { %1081 = vrcp.f32 %v464_v48  ;;  %v476_v54 = vand.u32 2147483648, %v464_v48  ;;  %v474_v56 = vand.u32 2147483647, %v464_v48  ;;  %vm470_vm11 = vweird.f32 %v464_v48 }
 0x2a3   :  { %v477_v61 = vor.u32 1.1754944e-38, %v476_v54  ;;  %vm475_vm13 = vcmp.eq.f32.partialorder %v474_v56, 8.507059e+37 }
 0x2a4   :  { %v1080_v49 = vpop.eup %1079 }
 0x2a5   :  { %v486_v50 = vadd.f32 1.0, %v1080_v49 }
 0x2a7   :  { %v1082_v51 = vpop.eup %1081  ;;  %1083 = vrcp.f32 %v486_v50  ;;  %v498_v16 = vand.u32 2147483648, %v486_v50  ;;  %v496_v18 = vand.u32 2147483647, %v486_v50  ;;  %vm492_vm15 = vweird.f32 %v486_v50 }
 0x2a8   :  { %v466_v52 = vmul.f32 %v1082_v51, %v464_v48  ;;  %vm471_vm10 = vweird.f32 %v1082_v51 }
 0x2a9   :  { %vm472_vm12 = vmor %vm470_vm11, %vm471_vm10  ;;  %v499_v21 = vor.u32 1.1754944e-38, %v498_v16  ;;  %vm497_vm2 = vcmp.eq.f32.partialorder %v496_v18, 8.507059e+37  ;;  %v1024_v16 = vld [vmem:[%s1473_s0 + $0x28] sm:$0xff] }
 0x2aa   :  { %v467_v53 = vsub.f32 1.0, %v466_v52 }
 0x2ac   :  { %v468_v55 = vmul.f32 %v1082_v51, %v467_v53 }
 0x2ad   :  { %v1084_v57 = vpop.eup %1083 }
 0x2ae   :  { %v488_v59 = vmul.f32 %v1084_v57, %v486_v50  ;;  %v469_v60 = vadd.f32 %v1082_v51, %v468_v55  ;;  %vm493_vm14 = vweird.f32 %v1084_v57 }
 0x2af   :  { %vm494_vm1 = vmor %vm492_vm15, %vm493_vm14 }
 0x2b0   :  { %v489_v62 = vsub.f32 1.0, %v488_v59  ;;  %v473_v3 = vsel %vm472_vm12, %v1082_v51, %v469_v60  ;;  %v1020_v51 = vld [vmem:[%s1475_s2 + $0x20] sm:$0xff] }
 0x2b1   :  { %v478_v12 = vsel %vm475_vm13, %v477_v61, %v473_v3  ;;  %v1026_v3 = vld [vmem:[%s1474_s1 + $0x28] sm:$0xff] }
 0x2b2   :  { %v490_v15 = vmul.f32 %v1084_v57, %v489_v62  ;;  %v504_v17 = vmul.f32 %v478_v12, %v456_v63 }
 0x2b4   :  { %v491_v19 = vadd.f32 %v1084_v57, %v490_v15  ;;  %v505_v20 = vadd.f32 %v1012_v14, %v504_v17 }
 0x2b6   :  { %v495_v22 = vsel %vm494_vm1, %v1084_v57, %v491_v19  ;;  %1085 = vtanh.f32 %v505_v20 }
 0x2b7   :  { %v500_v23 = vsel %vm497_vm2, %v499_v21, %v495_v22 }
 0x2b8   :  { %v507_v24 = vsub.f32 1.0, %v500_v23  ;;  %v509_v27 = vmul.f32 %v500_v23, %v1359_v38 }
 0x2bc   :  { %v1086_v25 = vpop.eup %1085 }
 0x2bd   :  { %v508_v26 = vmul.f32 %v1086_v25, %v507_v24 }
 0x2bf   :  { %v1390_v28 = vadd.f32 %v509_v27, %v508_v26 }
 0x2c1   :  { %1013 = vmatmul.msk.f32.vlgmr.msrb.gmra.mxu0 %vm30_vm0, %v1390_v28  ;;  %1014 = vmatmul.msk.f32.vlgmr.msrb.gmra.mxu1 %vm30_vm0, %v1390_v28 }
 0x2c2   :  { %1015 = vmatmul.msk.f32.vlgmr.msrb.gmra.mxu2 %vm30_vm0, %v1390_v28  ;;  %798 = vmatpush.msrb.mxu0 %v1204_v7 }
 0x2c3   :  { %874 = vmatpush.msrb.mxu1 %v1171_v0  ;;  %894 = vmatpush.msrb.mxu2 %v1176_v1  ;;  %v1016_v0 = vld [vmem:[%s1473_s0 + $0x20] sm:$0xff] }
 0x2c4   :  { %799 = vmatpush.msrb.mxu0 %v1212_v8  ;;  %v1018_v1 = vld [vmem:[%s1474_s1 + $0x20] sm:$0xff] }
 0x2c5   :  { %875 = vmatpush.msrb.mxu1 %v1181_v2  ;;  %895 = vmatpush.msrb.mxu2 %v1189_v4 }
 0x2c6   :  { %800 = vmatpush.msrb.mxu0 %v1232_v11 }
 0x2c7   :  { %876 = vmatpush.msrb.mxu1 %v1194_v5  ;;  %896 = vmatpush.msrb.mxu2 %v1199_v6 }
 0x2c8   :  { %801 = vmatpush.msrb.mxu0 %v1246_v13 }
 0x2c9   :  { %877 = vmatpush.msrb.mxu1 %v1217_v9  ;;  %897 = vmatpush.msrb.mxu2 %v1222_v10 }
 0x33e   :  { %v531_v2 = vpop.f32.mrf.mxu0  ;;  %v551_v4 = vpop.f32.mrf.mxu1 }
 0x33f   :  { %v576_v29 = vadd.f32 %v1016_v0, %v531_v2  ;;  %v598_v5 = vadd.f32 %v1018_v1, %v551_v4 }
 0x341   :  { %v1017_v31 = vmul.f32 -1.442695, %v576_v29  ;;  %v1019_v6 = vmul.f32 -1.442695, %v598_v5 }
 0x343   :  { %1087 = vpow2.f32 %v1017_v31 }
 0x344   :  { %1089 = vpow2.f32 %v1019_v6 }
 0x345   :  { %v571_v44 = vpop.f32.mrf.mxu2 }
 0x346   :  { %v572_v47 = vadd.f32 %v1290_v30, %v571_v44  ;;  %v1034_v44 = vld [vmem:[%s1474_s1 + $0x30] sm:$0xff] }
 0x349   :  { %v1088_v32 = vpop.eup %1087 }
 0x34a   :  { %v1090_v9 = vpop.eup %1089  ;;  %v580_v33 = vadd.f32 1.0, %v1088_v32  ;;  %v1028_v32 = vld [vmem:[%s1475_s2 + $0x28] sm:$0xff] }
 0x34b   :  { %v602_v10 = vadd.f32 1.0, %v1090_v9 }
 0x34c   :  { %1091 = vrcp.f32 %v580_v33  ;;  %v592_v40 = vand.u32 2147483648, %v580_v33  ;;  %v590_v42 = vand.u32 2147483647, %v580_v33  ;;  %vm586_vm4 = vweird.f32 %v580_v33 }
 0x34d   :  { %1093 = vrcp.f32 %v602_v10  ;;  %v614_v52 = vand.u32 2147483648, %v602_v10  ;;  %vm608_vm8 = vweird.f32 %v602_v10  ;;  %v612_v54 = vand.u32 2147483647, %v602_v10 }
 0x34e   :  { %v593_v46 = vor.u32 1.1754944e-38, %v592_v40  ;;  %vm591_vm6 = vcmp.eq.f32.partialorder %v590_v42, 8.507059e+37 }
 0x34f   :  { %v615_v57 = vor.u32 1.1754944e-38, %v614_v52  ;;  %vm613_vm10 = vcmp.eq.f32.partialorder %v612_v54, 8.507059e+37 }
 0x352   :  { %v1092_v34 = vpop.eup %1091 }
 0x353   :  { %v1094_v35 = vpop.eup %1093  ;;  %v582_v36 = vmul.f32 %v1092_v34, %v580_v33  ;;  %vm587_vm3 = vweird.f32 %v1092_v34 }
 0x354   :  { %v604_v37 = vmul.f32 %v1094_v35, %v602_v10  ;;  %vm588_vm5 = vmor %vm586_vm4, %vm587_vm3  ;;  %vm609_vm7 = vweird.f32 %v1094_v35 }
 0x355   :  { %v583_v38 = vsub.f32 1.0, %v582_v36  ;;  %vm610_vm9 = vmor %vm608_vm8, %vm609_vm7 }
 0x356   :  { %v605_v39 = vsub.f32 1.0, %v604_v37 }
 0x357   :  { %v584_v41 = vmul.f32 %v1092_v34, %v583_v38 }
 0x358   :  { %v606_v43 = vmul.f32 %v1094_v35, %v605_v39 }
 0x359   :  { %v585_v45 = vadd.f32 %v1092_v34, %v584_v41 }
 0x35a   :  { %v607_v49 = vadd.f32 %v1094_v35, %v606_v43  ;;  %v1032_v43 = vld [vmem:[%s1473_s0 + $0x30] sm:$0xff] }
 0x35b   :  { %v589_v48 = vsel %vm588_vm5, %v1092_v34, %v585_v45 }
 0x35c   :  { %v594_v50 = vsel %vm591_vm6, %v593_v46, %v589_v48  ;;  %v611_v56 = vsel %vm610_vm9, %v1094_v35, %v607_v49 }
 0x35d   :  { %v620_v53 = vmul.f32 %v594_v50, %v572_v47  ;;  %v616_v58 = vsel %vm613_vm10, %v615_v57, %v611_v56 }
 0x35e   :  { %v623_v59 = vsub.f32 1.0, %v616_v58  ;;  %v625_v62 = vmul.f32 %v616_v58, %v1390_v28 }
 0x35f   :  { %v621_v55 = vadd.f32 %v1020_v51, %v620_v53 }
 0x361   :  { %1095 = vtanh.f32 %v621_v55 }
 0x367   :  { %v1096_v60 = vpop.eup %1095 }
 0x368   :  { %v624_v61 = vmul.f32 %v1096_v60, %v623_v59 }
 0x36a   :  { %v626_v63 = vadd.f32 %v625_v62, %v624_v61 }
 0x36c   :  { %1021 = vmatmul.msk.f32.vlgmr.msrb.gmra.mxu3 %vm30_vm0, %v626_v63  ;;  %1022 = vmatmul.msk.f32.vlgmr.msra.gmra.mxu0 %vm30_vm0, %v626_v63 }
 0x36d   :  { %1023 = vmatmul.msk.f32.vlgmr.msra.gmra.mxu1 %vm30_vm0, %v626_v63  ;;  %914 = vmatpush.msrb.mxu3 %v1204_v7 }
 0x36f   :  { %915 = vmatpush.msrb.mxu3 %v1212_v8 }
 0x371   :  { %916 = vmatpush.msrb.mxu3 %v1232_v11 }
 0x373   :  { %917 = vmatpush.msrb.mxu3 %v1246_v13 }
 0x3e9   :  { %v667_v12 = vpop.f32.mrf.mxu0 }
 0x3ea   :  { %v714_v14 = vadd.f32 %v1026_v3, %v667_v12  ;;  %v687_v1 = vpop.f32.mrf.mxu1 }
 0x3eb   :  { %v688_v29 = vadd.f32 %v1290_v30, %v687_v1 }
 0x3ec   :  { %v1027_v15 = vmul.f32 -1.442695, %v714_v14 }
 0x3ee   :  { %1097 = vpow2.f32 %v1027_v15 }
 0x3ef   :  { %v647_v17 = vpop.f32.mrf.mxu3 }
 0x3f0   :  { %v692_v7 = vadd.f32 %v1024_v16, %v647_v17 }
 0x3f2   :  { %v1025_v18 = vmul.f32 -1.442695, %v692_v7 }
 0x3f4   :  { %v1098_v8 = vpop.eup %1097  ;;  %1099 = vpow2.f32 %v1025_v18 }
 0x3f5   :  { %v718_v11 = vadd.f32 1.0, %v1098_v8  ;;  %v1036_v8 = vld [vmem:[%s1475_s2 + $0x30] sm:$0xff] }
 0x3f7   :  { %1101 = vrcp.f32 %v718_v11  ;;  %v730_v9 = vand.u32 2147483648, %v718_v11  ;;  %vm724_vm1 = vweird.f32 %v718_v11  ;;  %v728_v10 = vand.u32 2147483647, %v718_v11 }
 0x3f9   :  { %v731_v36 = vor.u32 1.1754944e-38, %v730_v9  ;;  %vm729_vm3 = vcmp.eq.f32.partialorder %v728_v10, 8.507059e+37 }
 0x3fa   :  { %v1100_v13 = vpop.eup %1099 }
 0x3fb   :  { %v696_v19 = vadd.f32 1.0, %v1100_v13 }
 0x3fd   :  { %1103 = vrcp.f32 %v696_v19  ;;  %v1102_v20 = vpop.eup %1101  ;;  %v708_v26 = vand.u32 2147483648, %v696_v19  ;;  %v706_v28 = vand.u32 2147483647, %v696_v19  ;;  %vm702_vm12 = vweird.f32 %v696_v19 }
 0x3fe   :  { %v720_v21 = vmul.f32 %v1102_v20, %v718_v11  ;;  %vm725_vm15 = vweird.f32 %v1102_v20 }
 0x3ff   :  { %v709_v4 = vor.u32 1.1754944e-38, %v708_v26  ;;  %vm707_vm14 = vcmp.eq.f32.partialorder %v706_v28, 8.507059e+37  ;;  %vm726_vm2 = vmor %vm724_vm1, %vm725_vm15 }
 0x400   :  { %v721_v24 = vsub.f32 1.0, %v720_v21 }
 0x402   :  { %v722_v0 = vmul.f32 %v1102_v20, %v721_v24 }
 0x403   :  { %v1104_v22 = vpop.eup %1103 }
 0x404   :  { %v698_v23 = vmul.f32 %v1104_v22, %v696_v19  ;;  %vm703_vm11 = vweird.f32 %v1104_v22  ;;  %v723_v31 = vadd.f32 %v1102_v20, %v722_v0  ;;  %v1040_v0 = vld [vmem:[%s1473_s0 + $0x38] sm:$0xff] }
 0x405   :  { %vm704_vm13 = vmor %vm702_vm12, %vm703_vm11 }
 0x406   :  { %v699_v25 = vsub.f32 1.0, %v698_v23  ;;  %v727_v35 = vsel %vm726_vm2, %v1102_v20, %v723_v31 }
 0x407   :  { %v732_v37 = vsel %vm729_vm3, %v731_v36, %v727_v35 }
 0x408   :  { %v700_v27 = vmul.f32 %v1104_v22, %v699_v25  ;;  %v739_v38 = vsub.f32 1.0, %v732_v37  ;;  %v741_v41 = vmul.f32 %v732_v37, %v626_v63 }
 0x40a   :  { %v701_v2 = vadd.f32 %v1104_v22, %v700_v27 }
 0x40c   :  { %v705_v5 = vsel %vm704_vm13, %v1104_v22, %v701_v2 }
 0x40d   :  { %v710_v6 = vsel %vm707_vm14, %v709_v4, %v705_v5 }
 0x40e   :  { %v736_v33 = vmul.f32 %v710_v6, %v688_v29  ;;  %v1042_v29 = vld [vmem:[%s1474_s1 + $0x38] sm:$0xff] }
 0x410   :  { %v737_v34 = vadd.f32 %v1028_v32, %v736_v33 }
 0x412   :  { %1105 = vtanh.f32 %v737_v34 }
 0x418   :  { %v1106_v39 = vpop.eup %1105 }
 0x419   :  { %v740_v40 = vmul.f32 %v1106_v39, %v739_v38 }
 0x41b   :  { %v742_v42 = vadd.f32 %v741_v41, %v740_v40 }
 0x41d   :  { %1029 = vmatmul.msk.f32.vlgmr.msra.gmra.mxu2 %vm30_vm0, %v742_v42  ;;  %1030 = vmatmul.msk.f32.vlgmr.msra.gmra.mxu3 %vm30_vm0, %v742_v42 }
 0x41e   :  { %1031 = vmatmul.msk.f32.vlgmr.msrb.gmra.mxu0 %vm30_vm0, %v742_v42 }
 0x49b   :  { %v803_v3 = vpop.f32.mrf.mxu0 }
 0x49c   :  { %v804_v16 = vadd.f32 %v1290_v30, %v803_v3 }
 0x4a0   :  { %v763_v45 = vpop.f32.mrf.mxu2  ;;  %v783_v46 = vpop.f32.mrf.mxu3 }
 0x4a1   :  { %v808_v47 = vadd.f32 %v1032_v43, %v763_v45  ;;  %v830_v48 = vadd.f32 %v1034_v44, %v783_v46 }
 0x4a3   :  { %v1033_v49 = vmul.f32 -1.442695, %v808_v47  ;;  %v1035_v50 = vmul.f32 -1.442695, %v830_v48 }
 0x4a5   :  { %1107 = vpow2.f32 %v1033_v49  ;;  %v1044_v49 = vld [vmem:[%s1475_s2 + $0x38] sm:$0xff] }
 0x4a6   :  { %1109 = vpow2.f32 %v1035_v50 }
 0x4ab   :  { %v1108_v51 = vpop.eup %1107 }
 0x4ac   :  { %v1110_v52 = vpop.eup %1109  ;;  %v812_v53 = vadd.f32 1.0, %v1108_v51 }
 0x4ad   :  { %v834_v54 = vadd.f32 1.0, %v1110_v52 }
 0x4ae   :  { %1111 = vrcp.f32 %v812_v53  ;;  %v824_v60 = vand.u32 2147483648, %v812_v53  ;;  %v822_v63 = vand.u32 2147483647, %v812_v53  ;;  %vm818_vm5 = vweird.f32 %v812_v53 }
 0x4af   :  { %1113 = vrcp.f32 %v834_v54  ;;  %v846_v13 = vand.u32 2147483648, %v834_v54  ;;  %vm840_vm9 = vweird.f32 %v834_v54  ;;  %v844_v19 = vand.u32 2147483647, %v834_v54 }
 0x4b0   :  { %v825_v15 = vor.u32 1.1754944e-38, %v824_v60  ;;  %vm823_vm7 = vcmp.eq.f32.partialorder %v822_v63, 8.507059e+37 }
 0x4b1   :  { %v847_v22 = vor.u32 1.1754944e-38, %v846_v13  ;;  %vm845_vm11 = vcmp.eq.f32.partialorder %v844_v19, 8.507059e+37 }
 0x4b4   :  { %v1112_v55 = vpop.eup %1111 }
 0x4b5   :  { %v1114_v56 = vpop.eup %1113  ;;  %v814_v57 = vmul.f32 %v1112_v55, %v812_v53  ;;  %vm819_vm4 = vweird.f32 %v1112_v55 }
 0x4b6   :  { %v836_v58 = vmul.f32 %v1114_v56, %v834_v54  ;;  %vm820_vm6 = vmor %vm818_vm5, %vm819_vm4  ;;  %vm841_vm8 = vweird.f32 %v1114_v56 }
 0x4b7   :  { %v815_v59 = vsub.f32 1.0, %v814_v57  ;;  %vm842_vm10 = vmor %vm840_vm9, %vm841_vm8 }
 0x4b8   :  { %v837_v61 = vsub.f32 1.0, %v836_v58 }
 0x4b9   :  { %v816_v62 = vmul.f32 %v1112_v55, %v815_v59 }
 0x4ba   :  { %v838_v12 = vmul.f32 %v1114_v56, %v837_v61 }
 0x4bb   :  { %v817_v14 = vadd.f32 %v1112_v55, %v816_v62 }
 0x4bc   :  { %v839_v18 = vadd.f32 %v1114_v56, %v838_v12 }
 0x4bd   :  { %v821_v17 = vsel %vm820_vm6, %v1112_v55, %v817_v14 }
 0x4be   :  { %v826_v7 = vsel %vm823_vm7, %v825_v15, %v821_v17  ;;  %v843_v21 = vsel %vm842_vm10, %v1114_v56, %v839_v18 }
 0x4bf   :  { %v852_v11 = vmul.f32 %v826_v7, %v804_v16  ;;  %v848_v23 = vsel %vm845_vm11, %v847_v22, %v843_v21 }
 0x4c0   :  { %v855_v24 = vsub.f32 1.0, %v848_v23  ;;  %v857_v27 = vmul.f32 %v848_v23, %v742_v42 }
 0x4c1   :  { %v853_v20 = vadd.f32 %v1036_v8, %v852_v11 }
 0x4c3   :  { %1115 = vtanh.f32 %v853_v20 }
 0x4c9   :  { %v1116_v25 = vpop.eup %1115 }
 0x4ca   :  { %v856_v26 = vmul.f32 %v1116_v25, %v855_v24 }
 0x4cc   :  { %v858_v28 = vadd.f32 %v857_v27, %v856_v26 }
 0x4ce   :  { %1037 = vmatmul.msk.f32.vlgmr.msrb.gmra.mxu1 %vm30_vm0, %v858_v28  ;;  %1038 = vmatmul.msk.f32.vlgmr.msrb.gmra.mxu2 %vm30_vm0, %v858_v28 }
 0x4cf   :  { %1039 = vmatmul.msk.f32.vlgmr.msrb.gmra.mxu3 %vm30_vm0, %v858_v28 }
 0x54b   :  { %v879_v1 = vpop.f32.mrf.mxu1 }
 0x54c   :  { %v924_v2 = vadd.f32 %v1040_v0, %v879_v1 }
 0x54e   :  { %v1041_v4 = vmul.f32 -1.442695, %v924_v2 }
 0x550   :  { %1117 = vpow2.f32 %v1041_v4 }
 0x551   :  { %v899_v5 = vpop.f32.mrf.mxu2 }
 0x552   :  { %v946_v31 = vadd.f32 %v1042_v29, %v899_v5  ;;  %v919_v41 = vpop.f32.mrf.mxu3 }
 0x553   :  { %v920_v46 = vadd.f32 %v1290_v30, %v919_v41 }
 0x554   :  { %v1043_v6 = vmul.f32 -1.442695, %v946_v31 }
 0x556   :  { %v1118_v32 = vpop.eup %1117  ;;  %1119 = vpow2.f32 %v1043_v6 }
 0x557   :  { %v928_v9 = vadd.f32 1.0, %v1118_v32 }
 0x559   :  { %1121 = vrcp.f32 %v928_v9  ;;  %v940_v37 = vand.u32 2147483648, %v928_v9  ;;  %v938_v39 = vand.u32 2147483647, %v928_v9  ;;  %vm934_vm13 = vweird.f32 %v928_v9 }
 0x55b   :  { %v941_v44 = vor.u32 1.1754944e-38, %v940_v37  ;;  %vm939_vm15 = vcmp.eq.f32.partialorder %v938_v39, 8.507059e+37 }
 0x55c   :  { %v1120_v33 = vpop.eup %1119 }
 0x55d   :  { %v950_v10 = vadd.f32 1.0, %v1120_v33 }
 0x55f   :  { %v1122_v34 = vpop.eup %1121  ;;  %1123 = vrcp.f32 %v950_v10  ;;  %v962_v51 = vand.u32 2147483648, %v950_v10  ;;  %v960_v53 = vand.u32 2147483647, %v950_v10  ;;  %vm956_vm2 = vweird.f32 %v950_v10 }
 0x560   :  { %v930_v35 = vmul.f32 %v1122_v34, %v928_v9  ;;  %vm935_vm12 = vweird.f32 %v1122_v34 }
 0x561   :  { %vm936_vm14 = vmor %vm934_vm13, %vm935_vm12  ;;  %v963_v56 = vor.u32 1.1754944e-38, %v962_v51  ;;  %vm961_vm4 = vcmp.eq.f32.partialorder %v960_v53, 8.507059e+37 }
 0x562   :  { %v931_v36 = vsub.f32 1.0, %v930_v35 }
 0x564   :  { %v932_v38 = vmul.f32 %v1122_v34, %v931_v36 }
 0x565   :  { %v1124_v40 = vpop.eup %1123 }
 0x566   :  { %v952_v42 = vmul.f32 %v1124_v40, %v950_v10  ;;  %v933_v43 = vadd.f32 %v1122_v34, %v932_v38  ;;  %vm957_vm1 = vweird.f32 %v1124_v40 }
 0x567   :  { %vm958_vm3 = vmor %vm956_vm2, %vm957_vm1 }
 0x568   :  { %v953_v45 = vsub.f32 1.0, %v952_v42  ;;  %v937_v47 = vsel %vm936_vm14, %v1122_v34, %v933_v43 }
 0x569   :  { %v942_v48 = vsel %vm939_vm15, %v941_v44, %v937_v47 }
 0x56a   :  { %v954_v50 = vmul.f32 %v1124_v40, %v953_v45  ;;  %v968_v52 = vmul.f32 %v942_v48, %v920_v46 }
 0x56c   :  { %v955_v54 = vadd.f32 %v1124_v40, %v954_v50  ;;  %v969_v55 = vadd.f32 %v1044_v49, %v968_v52 }
 0x56e   :  { %v959_v57 = vsel %vm958_vm3, %v1124_v40, %v955_v54  ;;  %1125 = vtanh.f32 %v969_v55 }
 0x56f   :  { %v964_v30 = vsel %vm961_vm4, %v963_v56, %v959_v57 }
 0x570   :  { %v971_v58 = vsub.f32 1.0, %v964_v30  ;;  %v973_v61 = vmul.f32 %v964_v30, %v858_v28 }
 0x574   :  { %v1126_v59 = vpop.eup %1125 }
 0x575   :  { %v972_v60 = vmul.f32 %v1126_v59, %v971_v58 }
 0x577   :  { %v974_v62 = vadd.f32 %v973_v61, %v972_v60 }
 0x579   :  { %975 = vst.msk [vmem:[#allocation2] sm:$0xff] %vm30_vm0, %v974_v62 }
 0x57a   :  { %979 = vst.msk [vmem:[%s1476_s7] sm:$0xff] %vm30_vm0, %v974_v62 }

</bundles_post_ra>
